<compile_context>
chip_gen: v6e
topology: v6e:2x2x1
jax: 0.10.0
libtpu: 0.0.40
codegen_flags: <defaults>
</compile_context>

<pallas_src>
import functools

import jax
import jax.numpy as jnp
import numpy as np
from jax import lax
from jax.experimental import pallas as pl
from jax.experimental.pallas import tpu as pltpu


def _round_up(x, m):
    return (x + m - 1) // m * m


def _pick_tile_rows(H, W, target_rows=512):
    """Largest divisor of H whose tile (rows*W) stays near the ~512-row sweet spot."""
    best = 1
    for tr in range(1, H + 1):
        if H % tr == 0 and tr * W <= max(target_rows, W):
            best = tr
    return best


# ----------------------------------------------------------------------------
# Pallas kernel: one (batch, row-tile) per grid step.
#   x_ref   : (TMH, Cip) bf16   haloed fused slab, TMH = (TR+2)*W
#   wcat    : (Cip, Pp+Cop)     conv1 | downsample weights (BN folded), bf16
#   w2t/m/b : (3*Pp, Pp)        conv2 weights per kernel row (kw stacked), bf16
#   w3      : (Pp, Cop) bf16    conv3 weights (BN folded)
#   b*      : (1, C) f32        BN biases
#   o_ref   : (TM, Cop) f32     TM = TR*W output rows of this tile
# ----------------------------------------------------------------------------
def _bneck_dual_kernel(H, W, TR,
                       x_ref, wcat_ref, b1_ref, bd_ref,
                       w2t_ref, w2m_ref, w2b_ref, b2_ref,
                       w3_ref, b3_ref,
                       o_ref):
    f32, bf16 = jnp.float32, jnp.bfloat16
    TM = TR * W                      # rows written by this step
    TMH = (TR + 2) * W               # rows in the haloed input slab
    HW = H * W
    Pp = b1_ref.shape[-1]

    t = pl.program_id(1)
    slab = x_ref[...]                                                # (TMH, Cip) bf16

    # conv1 (1x1) and downsample (1x1) in ONE MXU pass (output width Pp+Cop).
    hcat = jnp.dot(slab, wcat_ref[...], preferred_element_type=f32)  # (TMH, Pp+Cop)
    h1 = jnp.maximum(hcat[:, :Pp] + b1_ref[...], 0.0)                # (TMH, Pp)
    idn = hcat[W:W + TM, Pp:] + bd_ref[...]                          # (TM, Cop)

    # Vertical zero padding of conv2's input: zero h1 rows outside the image
    # (only the first/last tile's halo rows are affected).
    row = lax.broadcasted_iota(jnp.int32, (TMH, 1), 0)
    g = t * TM - W + row                       # global flattened row of slab row
    h1 = jnp.where((g >= 0) & (g < HW), h1, 0.0)

    # ---- conv2: 3x3, stride 1, pad 1 -------------------------------------
    # Single tap-concat: taps[j] = (h1[j-1], h1[j], h1[j+1]) with horizontal
    # wrap masked to zero via the pre-roll column masks.  The three kernel
    # rows are then row-shifted slices of the same tensor:
    #   output row i (slab row i+W):  kh=0 -> taps[i], kh=1 -> taps[i+W],
    #                                 kh=2 -> taps[i+2W].
    w_idx = row % W
    h1_l = jnp.where(w_idx == W - 1, 0.0, h1)      # source of dw = -1 taps
    h1_r = jnp.where(w_idx == 0, 0.0, h1)          # source of dw = +1 taps
    taps = jnp.concatenate(
        [pltpu.roll(h1_l, 1, axis=0).astype(bf16),
         h1.astype(bf16),
         pltpu.roll(h1_r, TMH - 1, axis=0).astype(bf16)],
        axis=1)                                                      # (TMH, 3*Pp) bf16

    acc = jnp.dot(taps[0:TM], w2t_ref[...], preferred_element_type=f32)
    acc += jnp.dot(taps[W:W + TM], w2m_ref[...], preferred_element_type=f32)
    acc += jnp.dot(taps[2 * W:2 * W + TM], w2b_ref[...], preferred_element_type=f32)
    h2 = jnp.maximum(acc + b2_ref[...], 0.0).astype(bf16)            # (TM, Pp)

    # conv3 (1x1) + bias, residual add, final relu.
    h3 = jnp.dot(h2, w3_ref[...], preferred_element_type=f32) + b3_ref[...]
    o_ref[...] = jnp.maximum(h3 + idn, 0.0).astype(o_ref.dtype)      # (TM, Cop)


# ----------------------------------------------------------------------------
# Wrapper: NCHW in / NCHW out.  BN folding, lane padding, bf16 casts and the
# fusion add run once in XLA; the hot path runs in the Pallas kernel.
# ----------------------------------------------------------------------------
def bneck_dual_forward(x_nchw, extra_nchw, p, tile_rows=None):
    N, Cin, H, W = x_nchw.shape
    HW = H * W
    P = p["w1"].shape[-1]
    Cout = p["w3"].shape[-1]
    Cip, Pp, Cop = (_round_up(c, 128) for c in (Cin, P, Cout))
    f32, bf16 = jnp.float32, jnp.bfloat16

    TR = tile_rows if tile_rows is not None else _pick_tile_rows(H, W)
    assert H % TR == 0, "tile_rows must divide H"
    nT = H // TR
    TM, TMH = TR * W, (TR + 2) * W

    # fusion_fn(x, extra) = x + extra; NCHW -> NHWC; build haloed row slabs
    # (one zero image-row of padding at top/bottom, one-row overlap per tile).
    fused = (x_nchw + extra_nchw).astype(f32).transpose(0, 2, 3, 1)      # (N,H,W,Cin)
    fused = jnp.pad(fused, ((0, 0), (1, 1), (0, 0), (0, Cip - Cin)))     # (N,H+2,W,Cip)
    slabs = jnp.stack([fused[:, t * TR:t * TR + TR + 2] for t in range(nT)], axis=1)
    slabs = slabs.reshape(N, nT, TMH, Cip).astype(bf16)                  # (N,nT,TMH,Cip)

    def fold(w, s):   # fold BN scale into the conv weight (out-channel bcast)
        return (w * s.reshape((1,) * (w.ndim - 1) + (-1,))).astype(f32)

    def pad2(w, r, c):
        return jnp.pad(w, ((0, r - w.shape[0]), (0, c - w.shape[1])))

    def padb(b, c):
        b = b.reshape(1, -1).astype(f32)
        return jnp.pad(b, ((0, 0), (0, c - b.shape[1])))

    w1 = pad2(fold(p["w1"], p["s1"]), Cip, Pp)
    wd = pad2(fold(p["wd"], p["sd"]), Cip, Cop)
    wcat = jnp.concatenate([w1, wd], axis=1).astype(bf16)                # (Cip, Pp+Cop)
    w3 = pad2(fold(p["w3"], p["s3"]), Pp, Cop).astype(bf16)
    b1, b2 = padb(p["b1"], Pp), padb(p["b2"], Pp)
    b3, bd = padb(p["b3"], Cop), padb(p["bd"], Cop)

    w2 = fold(p["w2"], p["s2"])                                          # (3,3,P,P) HWIO
    w2 = jnp.pad(w2, ((0, 0), (0, 0), (0, Pp - P), (0, Pp - P))).astype(bf16)
    w2t = w2[0].reshape(3 * Pp, Pp)     # kh = 0, kw stacked on contraction axis
    w2m = w2[1].reshape(3 * Pp, Pp)     # kh = 1
    w2b = w2[2].reshape(3 * Pp, Pp)     # kh = 2

    def const_spec(shape):              # resident weights: no double-buffering
        nd = len(shape)
        return pl.BlockSpec(shape, lambda n, t, _nd=nd: (0,) * _nd,
                            pipeline_mode=pl.Buffered(1))

    kernel = functools.partial(_bneck_dual_kernel, H, W, TR)

    # Advisory cost (computed on the padded dims the kernel actually runs).
    flops = 2 * N * HW * (Cip * (Pp + Cop) + 9 * Pp * Pp + Pp * Cop)
    bytes_accessed = (2 * N * nT * TMH * Cip          # bf16 haloed activations in
                      + 4 * N * HW * Cop              # f32 activations out
                      + 2 * (Cip * (Pp + Cop) + 9 * Pp * Pp + Pp * Cop)
                      + 4 * 2 * (Pp + Cop))

    out_pad = pl.pallas_call(
        kernel,
        out_shape=jax.ShapeDtypeStruct((N, HW, Cop), f32),
        grid_spec=pltpu.PrefetchScalarGridSpec(
            num_scalar_prefetch=0,
            grid=(N, nT),
            in_specs=[
                pl.BlockSpec((None, None, TMH, Cip), lambda n, t: (n, t, 0, 0)),
                const_spec((Cip, Pp + Cop)),                   # conv1 | downsample
                const_spec((1, Pp)), const_spec((1, Cop)),     # b1, bd
                const_spec((3 * Pp, Pp)), const_spec((3 * Pp, Pp)),
                const_spec((3 * Pp, Pp)), const_spec((1, Pp)), # conv2 kh=0..2, b2
                const_spec((Pp, Cop)), const_spec((1, Cop)),   # conv3, b3
            ],
            out_specs=pl.BlockSpec((None, TM, Cop), lambda n, t: (n, t, 0)),
        ),
        compiler_params=pltpu.CompilerParams(
            dimension_semantics=("parallel", "arbitrary"),
            vmem_limit_bytes=48 * 1024 * 1024),
        cost_estimate=pl.CostEstimate(
            flops=flops, transcendentals=0, bytes_accessed=bytes_accessed),
    )(slabs, wcat, b1, bd, w2t, w2m, w2b, b2, w3, b3)

    out = out_pad if Cop == Cout else out_pad[:, :, :Cout]
    out = out.reshape(N, H, W, Cout)
    # TODO(synk): keep the consumer in NHWC in production to avoid this transpose pass.
    return jnp.transpose(out, (0, 3, 1, 2))


# ----------------------------------------------------------------------------
# Deterministic parameter construction (shapes implied by Bottleneck block).
# ----------------------------------------------------------------------------
def init_params(key, Cin, P, Cout, eps=1e-5):
    ks = jax.random.split(key, 20)

    def bn(kg, kb, km, kv, C):
        gamma = jax.random.uniform(kg, (C,), minval=0.5, maxval=1.5)
        beta = 0.1 * jax.random.normal(kb, (C,))
        mean = 0.1 * jax.random.normal(km, (C,))
        var = jax.random.uniform(kv, (C,), minval=0.5, maxval=1.5)
        scale = gamma / jnp.sqrt(var + eps)
        bias = beta - mean * scale
        return (scale.reshape(1, C).astype(jnp.float32),
                bias.reshape(1, C).astype(jnp.float32))

    p = {}
    p["w1"] = (0.1 * jax.random.normal(ks[0], (Cin, P))).astype(jnp.float32)
    p["s1"], p["b1"] = bn(ks[1], ks[2], ks[3], ks[4], P)
    p["w2"] = (0.1 * jax.random.normal(ks[5], (3, 3, P, P))).astype(jnp.float32)  # HWIO
    p["s2"], p["b2"] = bn(ks[6], ks[7], ks[8], ks[9], P)
    p["w3"] = (0.1 * jax.random.normal(ks[10], (P, Cout))).astype(jnp.float32)
    p["s3"], p["b3"] = bn(ks[11], ks[12], ks[13], ks[14], Cout)
    p["wd"] = (0.1 * jax.random.normal(ks[15], (Cin, Cout))).astype(jnp.float32)
    p["sd"], p["bd"] = bn(ks[16], ks[17], ks[18], ks[19], Cout)
    return p


# ----------------------------------------------------------------------------
# Pure-JAX f32 reference (for correctness check; kernel runs bf16 MXU inputs).
# ----------------------------------------------------------------------------
def reference_forward(x_nchw, extra_nchw, p):
    dn = ("NHWC", "HWIO", "NHWC")
    hi = lax.Precision.HIGHEST

    def conv(a, w, pad):
        return lax.conv_general_dilated(a, w, (1, 1), pad,
                                        dimension_numbers=dn, precision=hi)

    x = jnp.transpose(x_nchw, (0, 2, 3, 1))
    e = jnp.transpose(extra_nchw, (0, 2, 3, 1))
    fused = x + e
    h = jnp.maximum(conv(fused, p["w1"][None, None], "VALID") * p["s1"] + p["b1"], 0.0)
    h = jnp.maximum(conv(h, p["w2"], ((1, 1), (1, 1))) * p["s2"] + p["b2"], 0.0)
    h = conv(h, p["w3"][None, None], "VALID") * p["s3"] + p["b3"]
    idn = conv(fused, p["wd"][None, None], "VALID") * p["sd"] + p["bd"]
    out = jnp.maximum(h + idn, 0.0)
    return jnp.transpose(out, (0, 3, 1, 2))


if __name__ == "__main__":
    N, Cin, H, W = 2, 16, 16, 16
    planes, Cout = 8, 32           # bottleneck expansion = 4

    key = jax.random.PRNGKey(0)
    kx, ke, kp = jax.random.split(key, 3)
    x = jax.random.normal(kx, (N, Cin, H, W), dtype=jnp.float32)
    extra = jax.random.normal(ke, (N, Cin, H, W), dtype=jnp.float32)
    params = init_params(kp, Cin, planes, Cout)

    # tile_rows=8 -> 2 spatial tiles per batch element, exercising the halo path.
    out = bneck_dual_forward(x, extra, params, tile_rows=8)
    out = jax.block_until_ready(out)

    ref = jax.block_until_ready(reference_forward(x, extra, params))
    # bf16 MXU inputs with f32 accumulation -> loosened tolerance vs f32 reference.
    np.testing.assert_allclose(np.asarray(out), np.asarray(ref), rtol=5e-2, atol=5e-2)

    print("KERNEL_OK")
</pallas_src>

<mosaic_0001>
module attributes {stable_mosaic.version = 11 : i64} {
  func.func @_bneck_dual_kernel(%arg0: i32, %arg1: i32, %arg2: memref<1x1x160x128xbf16, #tpu.memory_space<vmem>>, %arg3: memref<128x256xbf16, #tpu.memory_space<vmem>>, %arg4: memref<1x128xf32, #tpu.memory_space<vmem>>, %arg5: memref<1x128xf32, #tpu.memory_space<vmem>>, %arg6: memref<384x128xbf16, #tpu.memory_space<vmem>>, %arg7: memref<384x128xbf16, #tpu.memory_space<vmem>>, %arg8: memref<384x128xbf16, #tpu.memory_space<vmem>>, %arg9: memref<1x128xf32, #tpu.memory_space<vmem>>, %arg10: memref<128x128xbf16, #tpu.memory_space<vmem>>, %arg11: memref<1x128xf32, #tpu.memory_space<vmem>>, %arg12: memref<1x128x128xf32, #tpu.memory_space<vmem>>) attributes {dimension_semantics = [#tpu.dimension_semantics<parallel>, #tpu.dimension_semantics<arbitrary>], iteration_bounds = array<i64: 2, 2>, scalar_prefetch = 0 : i64, scratch_operands = 0 : i64, tpu.core_type = #tpu.core_type<tc>, window_params = [{transform_indices = @transform_0, window_bounds = array<i64: 1, 1, 160, 128>}, {pipeline_mode = #tpu.pipeline_mode<synchronous>, transform_indices = @transform_1, window_bounds = array<i64: 128, 256>}, {pipeline_mode = #tpu.pipeline_mode<synchronous>, transform_indices = @transform_2, window_bounds = array<i64: 1, 128>}, {pipeline_mode = #tpu.pipeline_mode<synchronous>, transform_indices = @transform_3, window_bounds = array<i64: 1, 128>}, {pipeline_mode = #tpu.pipeline_mode<synchronous>, transform_indices = @transform_4, window_bounds = array<i64: 384, 128>}, {pipeline_mode = #tpu.pipeline_mode<synchronous>, transform_indices = @transform_5, window_bounds = array<i64: 384, 128>}, {pipeline_mode = #tpu.pipeline_mode<synchronous>, transform_indices = @transform_6, window_bounds = array<i64: 384, 128>}, {pipeline_mode = #tpu.pipeline_mode<synchronous>, transform_indices = @transform_7, window_bounds = array<i64: 1, 128>}, {pipeline_mode = #tpu.pipeline_mode<synchronous>, transform_indices = @transform_8, window_bounds = array<i64: 128, 128>}, {pipeline_mode = #tpu.pipeline_mode<synchronous>, transform_indices = @transform_9, window_bounds = array<i64: 1, 128>}, {transform_indices = @transform_10, window_bounds = array<i64: 1, 128, 128>}]} {
    %c0 = arith.constant 0 : index
    %c0_0 = arith.constant 0 : index
    %c0_1 = arith.constant 0 : index
    %c0_2 = arith.constant 0 : index
    %0 = vector.load %arg2[%c0, %c0_0, %c0_1, %c0_2] : memref<1x1x160x128xbf16, #tpu.memory_space<vmem>>, vector<1x1x160x128xbf16>
    %1 = vector.shape_cast %0 : vector<1x1x160x128xbf16> to vector<160x128xbf16>
    %c0_3 = arith.constant 0 : index
    %c0_4 = arith.constant 0 : index
    %2 = vector.load %arg3[%c0_3, %c0_4] : memref<128x256xbf16, #tpu.memory_space<vmem>>, vector<128x256xbf16>
    %cst = arith.constant dense<0.000000e+00> : vector<160x256xf32>
    %3 = tpu.matmul %1, %2, %cst {dimension_numbers = #tpu.dot_dimension_numbers<[1], [0], [0], [1], [0, 0, 1, 1], [], []>} : vector<160x128xbf16>, vector<128x256xbf16>, vector<160x256xf32> -> vector<160x256xf32>
    %4 = vector.extract_strided_slice %3 {offsets = [0, 0], sizes = [160, 128], strides = [1, 1]} : vector<160x256xf32> to vector<160x128xf32>
    %c0_5 = arith.constant 0 : index
    %c0_6 = arith.constant 0 : index
    %5 = vector.load %arg4[%c0_5, %c0_6] : memref<1x128xf32, #tpu.memory_space<vmem>>, vector<1x128xf32>
    %6 = vector.broadcast %5 : vector<1x128xf32> to vector<160x128xf32>
    %7 = arith.addf %4, %6 : vector<160x128xf32>
    %cst_7 = arith.constant 0.000000e+00 : f32
    %8 = vector.broadcast %cst_7 : f32 to vector<160x128xf32>
    %9 = arith.maximumf %7, %8 : vector<160x128xf32>
    %10 = vector.extract_strided_slice %3 {offsets = [16, 128], sizes = [128, 128], strides = [1, 1]} : vector<160x256xf32> to vector<128x128xf32>
    %c0_8 = arith.constant 0 : index
    %c0_9 = arith.constant 0 : index
    %11 = vector.load %arg5[%c0_8, %c0_9] : memref<1x128xf32, #tpu.memory_space<vmem>>, vector<1x128xf32>
    %12 = vector.broadcast %11 : vector<1x128xf32> to vector<128x128xf32>
    %13 = arith.addf %10, %12 : vector<128x128xf32>
    %14 = tpu.iota {dimensions = array<i32: 0>} : vector<160x1xi32>
    %c128_i32 = arith.constant 128 : i32
    %15 = arith.muli %arg1, %c128_i32 : i32
    %c16_i32 = arith.constant 16 : i32
    %16 = arith.subi %15, %c16_i32 : i32
    %17 = vector.broadcast %16 : i32 to vector<160x1xi32>
    %18 = arith.addi %17, %14 : vector<160x1xi32>
    %c0_i32 = arith.constant 0 : i32
    %19 = vector.broadcast %c0_i32 : i32 to vector<160x1xi32>
    %20 = arith.cmpi sge, %18, %19 : vector<160x1xi32>
    %c256_i32 = arith.constant 256 : i32
    %21 = vector.broadcast %c256_i32 : i32 to vector<160x1xi32>
    %22 = arith.cmpi slt, %18, %21 : vector<160x1xi32>
    %23 = arith.andi %20, %22 : vector<160x1xi1>
    %cst_10 = arith.constant 0.000000e+00 : f32
    %24 = vector.shape_cast %23 : vector<160x1xi1> to vector<160x1xi1>
    %25 = vector.broadcast %24 : vector<160x1xi1> to vector<160x128xi1>
    %26 = vector.broadcast %cst_10 : f32 to vector<160x128xf32>
    %27 = arith.select %25, %9, %26 : vector<160x128xi1>, vector<160x128xf32>
    %c16_i32_11 = arith.constant 16 : i32
    %c0_i32_12 = arith.constant 0 : i32
    %28 = arith.cmpi eq, %c16_i32_11, %c0_i32_12 : i32
    %c1_i32 = arith.constant 1 : i32
    %29 = arith.select %28, %c1_i32, %c16_i32_11 : i32
    %30 = vector.broadcast %29 : i32 to vector<160x1xi32>
    %31 = arith.remsi %14, %30 : vector<160x1xi32>
    %c0_i32_13 = arith.constant 0 : i32
    %32 = vector.broadcast %c0_i32_13 : i32 to vector<160x1xi32>
    %33 = arith.cmpi ne, %31, %32 : vector<160x1xi32>
    %c0_i32_14 = arith.constant 0 : i32
    %34 = vector.broadcast %c0_i32_14 : i32 to vector<160x1xi32>
    %35 = arith.cmpi slt, %31, %34 : vector<160x1xi32>
    %c0_i32_15 = arith.constant 0 : i32
    %36 = arith.cmpi slt, %29, %c0_i32_15 : i32
    %37 = vector.broadcast %36 : i1 to vector<160x1xi1>
    %38 = vector.broadcast %37 : vector<160x1xi1> to vector<160x1xi1>
    %39 = arith.xori %35, %38 : vector<160x1xi1>
    %40 = arith.andi %39, %33 : vector<160x1xi1>
    %41 = vector.broadcast %29 : i32 to vector<160x1xi32>
    %42 = arith.addi %31, %41 : vector<160x1xi32>
    %43 = arith.select %40, %42, %31 : vector<160x1xi1>, vector<160x1xi32>
    %c15_i32 = arith.constant 15 : i32
    %44 = vector.broadcast %c15_i32 : i32 to vector<160x1xi32>
    %45 = arith.cmpi eq, %43, %44 : vector<160x1xi32>
    %cst_16 = arith.constant 0.000000e+00 : f32
    %46 = vector.shape_cast %45 : vector<160x1xi1> to vector<160x1xi1>
    %47 = vector.broadcast %46 : vector<160x1xi1> to vector<160x128xi1>
    %48 = vector.broadcast %cst_16 : f32 to vector<160x128xf32>
    %49 = arith.select %47, %48, %27 : vector<160x128xi1>, vector<160x128xf32>
    %c0_i32_17 = arith.constant 0 : i32
    %50 = vector.broadcast %c0_i32_17 : i32 to vector<160x1xi32>
    %51 = arith.cmpi eq, %43, %50 : vector<160x1xi32>
    %cst_18 = arith.constant 0.000000e+00 : f32
    %52 = vector.shape_cast %51 : vector<160x1xi1> to vector<160x1xi1>
    %53 = vector.broadcast %52 : vector<160x1xi1> to vector<160x128xi1>
    %54 = vector.broadcast %cst_18 : f32 to vector<160x128xf32>
    %55 = arith.select %53, %54, %27 : vector<160x128xi1>, vector<160x128xf32>
    %c1_i32_19 = arith.constant 1 : i32
    %56 = tpu.dynamic_rotate %49 by %c1_i32_19 dim 0 : vector<160x128xf32>, i32 -> vector<160x128xf32>
    %57 = arith.truncf %56 : vector<160x128xf32> to vector<160x128xbf16>
    %58 = arith.truncf %27 : vector<160x128xf32> to vector<160x128xbf16>
    %c159_i32 = arith.constant 159 : i32
    %59 = tpu.dynamic_rotate %55 by %c159_i32 dim 0 : vector<160x128xf32>, i32 -> vector<160x128xf32>
    %60 = arith.truncf %59 : vector<160x128xf32> to vector<160x128xbf16>
    %61 = tpu.concatenate %57, %58, %60 in 1 : vector<160x128xbf16>, vector<160x128xbf16>, vector<160x128xbf16> -> vector<160x384xbf16>
    %62 = vector.extract_strided_slice %61 {offsets = [0, 0], sizes = [128, 384], strides = [1, 1]} : vector<160x384xbf16> to vector<128x384xbf16>
    %c0_20 = arith.constant 0 : index
    %c0_21 = arith.constant 0 : index
    %63 = vector.load %arg6[%c0_20, %c0_21] : memref<384x128xbf16, #tpu.memory_space<vmem>>, vector<384x128xbf16>
    %cst_22 = arith.constant dense<0.000000e+00> : vector<128x128xf32>
    %64 = tpu.matmul %62, %63, %cst_22 {dimension_numbers = #tpu.dot_dimension_numbers<[1], [0], [0], [1], [0, 0, 1, 1], [], []>} : vector<128x384xbf16>, vector<384x128xbf16>, vector<128x128xf32> -> vector<128x128xf32>
    %65 = vector.extract_strided_slice %61 {offsets = [16, 0], sizes = [128, 384], strides = [1, 1]} : vector<160x384xbf16> to vector<128x384xbf16>
    %c0_23 = arith.constant 0 : index
    %c0_24 = arith.constant 0 : index
    %66 = vector.load %arg7[%c0_23, %c0_24] : memref<384x128xbf16, #tpu.memory_space<vmem>>, vector<384x128xbf16>
    %cst_25 = arith.constant dense<0.000000e+00> : vector<128x128xf32>
    %67 = tpu.matmul %65, %66, %cst_25 {dimension_numbers = #tpu.dot_dimension_numbers<[1], [0], [0], [1], [0, 0, 1, 1], [], []>} : vector<128x384xbf16>, vector<384x128xbf16>, vector<128x128xf32> -> vector<128x128xf32>
    %68 = arith.addf %64, %67 : vector<128x128xf32>
    %69 = vector.extract_strided_slice %61 {offsets = [32, 0], sizes = [128, 384], strides = [1, 1]} : vector<160x384xbf16> to vector<128x384xbf16>
    %c0_26 = arith.constant 0 : index
    %c0_27 = arith.constant 0 : index
    %70 = vector.load %arg8[%c0_26, %c0_27] : memref<384x128xbf16, #tpu.memory_space<vmem>>, vector<384x128xbf16>
    %cst_28 = arith.constant dense<0.000000e+00> : vector<128x128xf32>
    %71 = tpu.matmul %69, %70, %cst_28 {dimension_numbers = #tpu.dot_dimension_numbers<[1], [0], [0], [1], [0, 0, 1, 1], [], []>} : vector<128x384xbf16>, vector<384x128xbf16>, vector<128x128xf32> -> vector<128x128xf32>
    %72 = arith.addf %68, %71 : vector<128x128xf32>
    %c0_29 = arith.constant 0 : index
    %c0_30 = arith.constant 0 : index
    %73 = vector.load %arg9[%c0_29, %c0_30] : memref<1x128xf32, #tpu.memory_space<vmem>>, vector<1x128xf32>
    %74 = vector.broadcast %73 : vector<1x128xf32> to vector<128x128xf32>
    %75 = arith.addf %72, %74 : vector<128x128xf32>
    %cst_31 = arith.constant 0.000000e+00 : f32
    %76 = vector.broadcast %cst_31 : f32 to vector<128x128xf32>
    %77 = arith.maximumf %75, %76 : vector<128x128xf32>
    %78 = arith.truncf %77 : vector<128x128xf32> to vector<128x128xbf16>
    %c0_32 = arith.constant 0 : index
    %c0_33 = arith.constant 0 : index
    %79 = vector.load %arg10[%c0_32, %c0_33] : memref<128x128xbf16, #tpu.memory_space<vmem>>, vector<128x128xbf16>
    %cst_34 = arith.constant dense<0.000000e+00> : vector<128x128xf32>
    %80 = tpu.matmul %78, %79, %cst_34 {dimension_numbers = #tpu.dot_dimension_numbers<[1], [0], [0], [1], [0, 0, 1, 1], [], []>} : vector<128x128xbf16>, vector<128x128xbf16>, vector<128x128xf32> -> vector<128x128xf32>
    %c0_35 = arith.constant 0 : index
    %c0_36 = arith.constant 0 : index
    %81 = vector.load %arg11[%c0_35, %c0_36] : memref<1x128xf32, #tpu.memory_space<vmem>>, vector<1x128xf32>
    %82 = vector.broadcast %81 : vector<1x128xf32> to vector<128x128xf32>
    %83 = arith.addf %80, %82 : vector<128x128xf32>
    %84 = arith.addf %83, %13 : vector<128x128xf32>
    %cst_37 = arith.constant 0.000000e+00 : f32
    %85 = vector.broadcast %cst_37 : f32 to vector<128x128xf32>
    %86 = arith.maximumf %84, %85 : vector<128x128xf32>
    %c0_38 = arith.constant 0 : index
    %c0_39 = arith.constant 0 : index
    %c0_40 = arith.constant 0 : index
    %87 = vector.load %arg12[%c0_38, %c0_39, %c0_40] : memref<1x128x128xf32, #tpu.memory_space<vmem>>, vector<1x128x128xf32>
    %88 = vector.shape_cast %87 : vector<1x128x128xf32> to vector<128x128xf32>
    %89 = vector.shape_cast %86 : vector<128x128xf32> to vector<1x128x128xf32>
    tpu.vector_store %arg12[%c0_38, %c0_39, %c0_40], %89 {strides = array<i32>} : memref<1x128x128xf32, #tpu.memory_space<vmem>>, vector<1x128x128xf32>,
    return
  }
  func.func @transform_0(%arg0: i32, %arg1: i32) -> (i32, i32, i32, i32) {
    %c0_i32 = arith.constant 0 : i32
    %c0_i32_0 = arith.constant 0 : i32
    %c0_i32_1 = arith.constant 0 : i32
    return %arg0, %arg1, %c0_i32, %c0_i32_0 : i32, i32, i32, i32
  }
  func.func @transform_1(%arg0: i32, %arg1: i32) -> (i32, i32) {
    %c0_i32 = arith.constant 0 : i32
    %c0_i32_0 = arith.constant 0 : i32
    %c0_i32_1 = arith.constant 0 : i32
    return %c0_i32, %c0_i32_0 : i32, i32
  }
  func.func @transform_2(%arg0: i32, %arg1: i32) -> (i32, i32) {
    %c0_i32 = arith.constant 0 : i32
    %c0_i32_0 = arith.constant 0 : i32
    %c0_i32_1 = arith.constant 0 : i32
    return %c0_i32, %c0_i32_0 : i32, i32
  }
  func.func @transform_3(%arg0: i32, %arg1: i32) -> (i32, i32) {
    %c0_i32 = arith.constant 0 : i32
    %c0_i32_0 = arith.constant 0 : i32
    %c0_i32_1 = arith.constant 0 : i32
    return %c0_i32, %c0_i32_0 : i32, i32
  }
  func.func @transform_4(%arg0: i32, %arg1: i32) -> (i32, i32) {
    %c0_i32 = arith.constant 0 : i32
    %c0_i32_0 = arith.constant 0 : i32
    %c0_i32_1 = arith.constant 0 : i32
    return %c0_i32, %c0_i32_0 : i32, i32
  }
  func.func @transform_5(%arg0: i32, %arg1: i32) -> (i32, i32) {
    %c0_i32 = arith.constant 0 : i32
    %c0_i32_0 = arith.constant 0 : i32
    %c0_i32_1 = arith.constant 0 : i32
    return %c0_i32, %c0_i32_0 : i32, i32
  }
  func.func @transform_6(%arg0: i32, %arg1: i32) -> (i32, i32) {
    %c0_i32 = arith.constant 0 : i32
    %c0_i32_0 = arith.constant 0 : i32
    %c0_i32_1 = arith.constant 0 : i32
    return %c0_i32, %c0_i32_0 : i32, i32
  }
  func.func @transform_7(%arg0: i32, %arg1: i32) -> (i32, i32) {
    %c0_i32 = arith.constant 0 : i32
    %c0_i32_0 = arith.constant 0 : i32
    %c0_i32_1 = arith.constant 0 : i32
    return %c0_i32, %c0_i32_0 : i32, i32
  }
  func.func @transform_8(%arg0: i32, %arg1: i32) -> (i32, i32) {
    %c0_i32 = arith.constant 0 : i32
    %c0_i32_0 = arith.constant 0 : i32
    %c0_i32_1 = arith.constant 0 : i32
    return %c0_i32, %c0_i32_0 : i32, i32
  }
  func.func @transform_9(%arg0: i32, %arg1: i32) -> (i32, i32) {
    %c0_i32 = arith.constant 0 : i32
    %c0_i32_0 = arith.constant 0 : i32
    %c0_i32_1 = arith.constant 0 : i32
    return %c0_i32, %c0_i32_0 : i32, i32
  }
  func.func @transform_10(%arg0: i32, %arg1: i32) -> (i32, i32, i32) {
    %c0_i32 = arith.constant 0 : i32
    %c0_i32_0 = arith.constant 0 : i32
    return %arg0, %arg1, %c0_i32 : i32, i32, i32
  }
}

</mosaic_0001>

<bundles_post_ra>
// kernel: tpu_custom_call.1
= control target key start
LH: loop header
LB: loop body
LE: loop exit
PB: predicated region body
PF: predicated region fallthrough
CT: control target
= control target key end

     0   :  { %s5674_s0 = inlined_call_operand.hbm [shape: bf16[2,2,160,128], index: 0, kind: input, shape index: {}]   ;;  %s5675_s1 = inlined_call_operand.hbm [shape: bf16[128,256], index: 1, kind: input, shape index: {}]   ;;  %s5676_s2 = inlined_call_operand.vmem [shape: f32[1,128], index: 2, kind: input, shape index: {}]   ;;  %s5677_s3 = inlined_call_operand.vmem [shape: f32[1,128], index: 3, kind: input, shape index: {}]   ;;  %s5678_s4 = inlined_call_operand.hbm [shape: bf16[384,128], index: 4, kind: input, shape index: {}]   ;;  %s5679_s5 = inlined_call_operand.hbm [shape: bf16[384,128], index: 5, kind: input, shape index: {}]   ;;  %s5680_s6 = inlined_call_operand.hbm [shape: bf16[384,128], index: 6, kind: input, shape index: {}]   ;;  %s5681_s7 = inlined_call_operand.vmem [shape: f32[1,128], index: 7, kind: input, shape index: {}]   ;;  %s5682_s8 = inlined_call_operand.hbm [shape: bf16[128,128], index: 8, kind: input, shape index: {}]   ;;  %s5683_s9 = inlined_call_operand.vmem [shape: f32[1,128], index: 9, kind: input, shape index: {}]   ;;  %s5684_s10 = inlined_call_operand.hbm [shape: f32[2,256,128], index: 10, kind: output, shape index: {}]  }
   0x1   :  { %5722 = sst [smem:[#allocation51_spill]] %s5675_s1 }
   0x2   :  { %5723 = sst [smem:[#allocation52_spill]] %s5677_s3 }
   0x3   :  { %5724 = sst [smem:[#allocation53_spill]] %s5678_s4 }
   0x4   :  { %5725 = sst [smem:[#allocation54_spill]] %s5679_s5 }
   0x5   :  { %5726 = sst [smem:[#allocation55_spill]] %s5680_s6 }
   0x6   :  { %5727 = sst [smem:[#allocation56_spill]] %s5682_s8 }
   0x7   :  { %5728 = sst [smem:[#allocation57_spill]] %s5684_s10 }
   0x8   :  { %15 = vsyncpa [#allocation3], 0 }
   0x9   :  { %17 = vsyncpa [#allocation3 + $0x1], 0 }
   0xa   :  { %18 = vsyncpa [#allocation6], 0 }
   0xb   :  { %19 = vsyncpa [#allocation9], 0 }
   0xc   :  { %20 = vsyncpa [#allocation12], 0 }
   0xd   :  { %21 = vsyncpa [#allocation4], 0 }
   0xe   :  { %23 = vsyncpa [#allocation4 + $0x1], 0  ;;  %s4311_s13 = smov 0   ;;  %s4313_s14 = smov 0  }
   0xf   :  { %s4315_s15 = smov 0   ;;  %s4317_s16 = smov 0  }
  0x10   :  { %s4319_s17 = smov 0   ;;  %s4321_s18 = smov 0  }
  0x11   :  { %s4323_s19 = smov 0   ;;  %s4325_s20 = smov 0  }
  0x12 LB: > { %5729 = sst [smem:[#allocation19_spill]] %s4228_s17  ;;  %s5685_s21 = sadd.s32 4294967295, %s4240_s20   ;;  %s4240_s20 = sphi %s4325_s20, %s29_s20   ;;  %s4236_s19 = sphi %s4323_s19, %s5933_s19   ;;  %s4232_s18 = sphi %s4321_s18, %s5938_s18   ;;  %s4228_s17 = sphi %s4319_s17, %s5931_s17   ;;  %s4224_s16 = sphi %s4317_s16, %s5937_s16   ;;  %s4220_s15 = sphi %s4315_s15, %s5936_s15   ;;  %s4216_s14 = sphi %s4313_s14, %s5935_s14   ;;  %s4212_s13 = sphi %s4311_s13, %s5934_s13  }
  0x13   : > { %5730 = sst [smem:[#allocation20_spill]] %s4236_s19  ;;  %p3115_p0 = scmp.ge.s32.totalorder %s4240_s20, 1 }
  0x14   : > { %p4355_p1 = scmp.eq.s32.totalorder %s5685_s21, 0  ;;  %p291_p2 = scmp.lt.s32.totalorder %s4240_s20, 5 }
  0x15   : > { %s4242_s24 = smov [#allocation5]   ;;  %s4243_s27 = smov [#allocation8]  }
  0x16   : > { %p4360_p3 = pnand %p3115_p0, %p291_p2  ;;  %s303_s25 = sshll.u32 %s4242_s24, 4  ;;  %s304_s25 = int_to_ptr.vmem [resolvable:$true] %s303_s25 }
  0x17   : > { %s335_s28 = sshll.u32 %s4243_s27, 4  ;;  %s3985_s30 = scalar_lea.vmem %s304_s25, 2048  ;;  %s336_s28 = int_to_ptr.vmem [resolvable:$true] %s335_s28 }
  0x18   : > { %p3748_p4 = pneg %p4360_p3  ;;  %p3986_p7 = scmp.ne.s32.totalorder %s304_s25, %s3985_s30 }
  0x19   : > { %p3993_p10 = scmp.lt.s32.totalorder %s304_s25, %s304_s25  ;;  %p3994_p11 = scmp.lt.s32.totalorder %s3985_s30, %s3985_s30 }
  0x1a   : > { %p4368_p5 = pnand %p3748_p4, %p4355_p1 }
  0x1b   : > { %p3995_p12 = por %p3994_p11, %p3993_p10 }
  0x1c   : > { %p4374_p6 = pneg %p4368_p5 }
  0x1e   : > { %p3988_p8 = pnand %p3986_p7, %p4374_p6 }
  0x20   : > { %p3989_p9 = pneg %p3988_p8 }
  0x22   : > { %p3996_p13 = pnand %p3995_p12, %p3989_p9 }
  0x24   : > { %3999 = shalt.err (!%p3996_p13)
}
  0x25   : > { %s4244_s11 = smov 128   ;;  %s4245_s12 = smov 8  }
  0x26   : > { %s5735_s1 = sld [smem:[#allocation51_spill]]  ;;  %s4246_s21 = smov [#allocation7]  }
  0x27   : > { %s322_s10 = sshll.u32 %s4246_s21, 4  ;;  %s4011_s17 = scalar_lea.vmem %s336_s28, 3072  ;;  %s323_s10 = int_to_ptr.vmem [resolvable:$true] %s322_s10 }
  0x28   : > { %p4012_p0 = scmp.ne.s32.totalorder %s336_s28, %s4011_s17  ;;  %p4019_p7 = scmp.lt.s32.totalorder %s336_s28, %s336_s28 }
  0x29   : > { %p4020_p8 = scmp.lt.s32.totalorder %s4011_s17, %s4011_s17 }
  0x2a   : > { %p4014_p2 = pnand %p4012_p0, %p4374_p6 }
  0x2b   : > { %p4021_p9 = por %p4020_p8, %p4019_p7 }
  0x2c   : > { %3751 = dma.hbm_to_vmem [thread:$0]  (!%p4368_p5), %s5735_s1, 2048, %s304_s25, [#allocation6], %s4244_s11, %s4244_s11, %s4245_s12  }
  0x2d   : > { %p4015_p4 = pneg %p4014_p2 }
  0x2f   : > { %p4022_p10 = pnand %p4021_p9, %p4015_p4 }
  0x31   : > { %4025 = shalt.err (!%p4022_p10)
}
  0x32   : > { %s5687_s30 = smov 64   ;;  %s5688_s3 = smov 4  }
  0x33   : > { %s5736_s5 = sld [smem:[#allocation54_spill]]  ;;  %s4037_s11 = scalar_lea.vmem %s323_s10, 3072 }
  0x34   : > { %p4038_p11 = scmp.ne.s32.totalorder %s323_s10, %s4037_s11  ;;  %p4045_p0 = scmp.lt.s32.totalorder %s323_s10, %s323_s10 }
  0x35   : > { %p4046_p2 = scmp.lt.s32.totalorder %s4037_s11, %s4037_s11 }
  0x36   : > { %p4040_p12 = pnand %p4038_p11, %p4374_p6 }
  0x37   : > { %p4047_p4 = por %p4046_p2, %p4045_p0 }
  0x38   : > { %p4041_p13 = pneg %p4040_p12 }
  0x39   : > { %3757 = dma.hbm_to_vmem [thread:$0]  (!%p4368_p5), %s5736_s5, 3072, %s336_s28, [#allocation9], %s5687_s30, %s5687_s30, %s5688_s3  }
  0x3a   : > { %p4048_p7 = pnand %p4047_p4, %p4041_p13 }
  0x3c   : > { %4051 = shalt.err (!%p4048_p7)
}
  0x3d   : > { %s5737_s4 = sld [smem:[#allocation53_spill]]  ;;  %s4249_s28 = smov [#allocation10]  }
  0x3e   : > { %s348_s24 = sshll.u32 %s4249_s28, 4  ;;  %s4250_s27 = smov [#allocation11]   ;;  %s349_s24 = int_to_ptr.vmem [resolvable:$true] %s348_s24 }
  0x3f   : > { %s364_s25 = sshll.u32 %s4250_s27, 4  ;;  %s4063_s21 = scalar_lea.vmem %s349_s24, 3072  ;;  %s365_s25 = int_to_ptr.vmem [resolvable:$true] %s364_s25 }
  0x40   : > { %p4064_p8 = scmp.ne.s32.totalorder %s349_s24, %s4063_s21  ;;  %p4071_p11 = scmp.lt.s32.totalorder %s349_s24, %s349_s24 }
  0x41   : > { %p4072_p12 = scmp.lt.s32.totalorder %s4063_s21, %s4063_s21 }
  0x42   : > { %p4066_p9 = pnand %p4064_p8, %p4374_p6 }
  0x43   : > { %3754 = dma.hbm_to_vmem [thread:$0]  (!%p4368_p5), %s5737_s4, 3072, %s323_s10, [#allocation6], %s5687_s30, %s5687_s30, %s5688_s3  }
  0x44   : > { %p4067_p10 = pneg %p4066_p9  ;;  %p4073_p13 = por %p4072_p12, %p4071_p11 }
  0x46   : > { %p4074_p0 = pnand %p4073_p13, %p4067_p10 }
  0x48   : > { %4077 = shalt.err (!%p4074_p0)
}
  0x49   : > { %s5738_s6 = sld [smem:[#allocation55_spill]]  ;;  %s4089_s17 = scalar_lea.vmem %s365_s25, 1024 }
  0x4a   : > { %p4090_p2 = scmp.ne.s32.totalorder %s365_s25, %s4089_s17  ;;  %p4097_p8 = scmp.lt.s32.totalorder %s365_s25, %s365_s25 }
  0x4b   : > { %p4098_p9 = scmp.lt.s32.totalorder %s4089_s17, %s4089_s17 }
  0x4c   : > { %p4092_p4 = pnand %p4090_p2, %p4374_p6 }
  0x4d   : > { %p4099_p10 = por %p4098_p9, %p4097_p8 }
  0x4e   : > { %p4093_p7 = pneg %p4092_p4 }
  0x4f   : > { %3760 = dma.hbm_to_vmem [thread:$0]  (!%p4368_p5), %s5738_s6, 3072, %s349_s24, [#allocation9], %s5687_s30, %s5687_s30, %s5688_s3  }
  0x50   : > { %p4100_p11 = pnand %p4099_p10, %p4093_p7 }
  0x52   : > { %4103 = shalt.err (!%p4100_p11)
}
  0x53   : > { %s5739_s8 = sld [smem:[#allocation56_spill]]  ;;  %s3114_s26 = sadd.s32 4294967294, %s4240_s20  }
  0x54   : > { %s38_s29 = sadd.s32 1, %s4232_s18  ;;  %s41_s24 = sadd.s32 1, %s4236_s19 }
  0x55   : > { %p39_p6 = scmp.ge.s32.totalorder %s38_s29, 2  ;;  %s50_s27 = sadd.s32 1, %s4220_s15 }
  0x56   : > { %p57_p12 = scmp.ne.s32.totalorder %s4220_s15, %s4216_s14  ;;  %p63_p0 = scmp.ne.s32.totalorder %s4216_s14, %s4212_s13 }
  0x57   : > { %s5940_s29 = smov (%p39_p6, %s38_s29), 0  ;;  %s5942_s24 = smov (!%p39_p6, %s41_s24), %s4236_s19 }
  0x58   : > { %5740 = sst [smem:[#allocation21_spill]] %s5940_s29  ;;  %s46_s21 = ssub.s32 %s4232_s18, %s5940_s29 }
  0x59   : > { %3763 = dma.hbm_to_vmem [thread:$0]  (!%p4368_p5), %s5739_s8, 1024, %s365_s25, [#allocation12], %s5687_s30, %s5687_s30, %s5688_s3  }
  0x5a   : > { %p58_p5 = scmp.eq.s32.totalorder %s4240_s20, 0  ;;  %p43_p13 = scmp.ge.s32.totalorder %s5942_s24, 2 }
  0x5b   : > { %s5741_s25 = sadd.s32 4294967295, %s4240_s20   ;;  %p284_p4 = scmp.eq.s32.totalorder %s3114_s26, 3 }
  0x5c   : > { %p278_p2 = scmp.eq.s32.totalorder %s5741_s25, 3  ;;  %s5944_s24 = smov (%p43_p13, %s5942_s24), 0 }
  0x5d   : > { %5742 = sst [smem:[#allocation22_spill]] %s5944_s24  ;;  %p4445_p7 = por %p4355_p1, %p63_p0 }
  0x5e   : > { %p4452_p8 = por %p278_p2, %p57_p12  ;;  %s45_s17 = ssub.s32 %s4236_s19, %s5944_s24 }
  0x5f   : > { %p4458_p9 = por %p284_p4, %p63_p0  ;;  %s47_s28 = sor.u32 %s46_s21, %s45_s17 }
  0x60   : > { %p59_p10 = por %p58_p5, %p57_p12  ;;  %p48_p11 = scmp.eq.s32.totalorder %s47_s28, 0 }
  0x61   : > { %s381_s26 = sand.u32 1, %s4220_s15   ;;  %p3777_p6 = scmp.lt.s32.totalorder %s4240_s20, 4 }
  0x62   : > { %s3720_s25 = smul.u32 80, %s381_s26  ;;  %s382_s29 = scalar_lea.sflag [#allocation3], %s381_s26 }
  0x63   : > { %s4468_s30 = scalar_select %p48_p11, %s4220_s15, %s50_s27  }
  0x64   : > { %s3721_s3 = smul.u32 20, %s4232_s18  ;;  %s385_s4 = scalar_lea.vmem [#allocation2], %s3720_s25 }
  0x65   : > { %s3722_s1 = smul.u32 40, %s4236_s19  ;;  %s394_s5 = sshll.u32 %s385_s4, 4  ;;  %s395_s5 = int_to_ptr.vmem [resolvable:$true] %s394_s5 }
  0x66   : > { %p4472_p13 = pnand %p3777_p6, %p59_p10  ;;  %s4117_s27 = scalar_lea.vmem %s395_s5, 1280 }
  0x67   : > { %s391_s8 = sadd.s32 %s3722_s1, %s3721_s3  ;;  %p4118_p5 = scmp.ne.s32.totalorder %s395_s5, %s4117_s27 }
  0x68   : > { %s3122_s21 = sshll.u32 %s391_s8, 6  ;;  %p4106_p12 = pneg %p4472_p13 }
  0x69   : > { %s393_s28 = scalar_lea.hbm %s5674_s0, %s3122_s21  ;;  %s4251_s4 = smov [#allocation2]  }
  0x6a   : > { %p4120_p0 = pnand %p4118_p5, %p4106_p12  ;;  %s4122_s25 = sshll.u32 %s4251_s4, 4  ;;  %s4123_s25 = int_to_ptr.vmem [resolvable:$false] %s4122_s25 }
  0x6b   : > { %s4124_s19 = scalar_lea.vmem %s4123_s25, 2560  ;;  %p4125_p4 = scmp.lt.s32.totalorder %s395_s5, %s4123_s25 }
  0x6c   : > { %p4121_p2 = pneg %p4120_p0  ;;  %p4126_p10 = scmp.lt.s32.totalorder %s4124_s19, %s4117_s27 }
  0x6e   : > { %p4127_p11 = por %p4126_p10, %p4125_p4 }
  0x70   : > { %p4128_p6 = pnand %p4127_p11, %p4121_p2 }
  0x72   : > { %4131 = shalt.err (!%p4128_p6)
}
  0x73   : > { %s5747_s1 = smov 4   ;;  %s5748_s3 = smov 64  }
  0x74   : > { %3767 = dma.hbm_to_vmem [thread:$0]  (!%p4472_p13), %s393_s28, 1280, %s395_s5, %s382_s29, %s5748_s3, %s5748_s3, %s5747_s1  }
  0x75   : > { %406 = sbr.rel (%p4360_p3) target bundleno = 996 (0x3e4), region = 60 }
  0x7a   : > { %s4489_s8 = sand.u32 1, %s4216_s14  }
  0x7b   : > { %s3723_s24 = smul.u32 80, %s4489_s8  ;;  %s409_s19 = scalar_lea.sflag [#allocation3], %s4489_s8 }
  0x7d   : > { %s4493_s26 = scalar_lea.vmem [#allocation2], %s3723_s24 }
  0x7e   : > { %4191 = dma.done.wait (%p4445_p7), %s409_s19, 1280  }
  0x7f   : > { %4193 = vsyncadd (%p4445_p7), %s409_s19, 4294966016 }
  0x80   : > { %4195 = dma.done.wait (%p4355_p1), [#allocation6], 5120  }
  0x81   : > { %4197 = vsyncadd (%p4355_p1), [#allocation6], 4294962176 }
  0x82   : > { %4199 = dma.done.wait (%p4355_p1), [#allocation9], 6144  }
  0x83   : > { %4201 = vsyncadd (%p4355_p1), [#allocation9], 4294961152 }
  0x84   : > { %4203 = dma.done.wait (%p4355_p1), [#allocation12], 1024  }
  0x85   : > { %4205 = vsyncadd (%p4355_p1), [#allocation12], 4294966272  ;;  %v4252_v0 = vmov 0   ;;  %v3860_v1 = vld [vmem:[#allocation5 + $0x74] ss:$8 sps:$4 sm:$0xff]   ;;  %v3898_v21 = vld [vmem:[#allocation8 + $0x68] sm:$0xff]   ;;  %v846_v60 = vlaneseq }
  0x86   : > { %679 = vmatprep.mubr.bf16.mxu0 %v4252_v0  ;;  %v3862_v2 = vld [vmem:[#allocation5 + $0x70] ss:$8 sps:$4 sm:$0xff]   ;;  %647 = vmatprep.subr.bf16.mxu0 %v3860_v1  ;;  %v3863_v3 = vld [vmem:[#allocation5 + $0x64] ss:$8 sps:$4 sm:$0xff]   ;;  %v3865_v4 = vld [vmem:[#allocation5 + $0x60] ss:$8 sps:$4 sm:$0xff]  }
  0x87   : > { %648 = vmatpush1.bf16.msra.mxu0 %v3862_v2  ;;  %v3866_v5 = vld [vmem:[#allocation5 + $0x54] ss:$8 sps:$4 sm:$0xff]   ;;  %v3868_v6 = vld [vmem:[#allocation5 + $0x50] ss:$8 sps:$4 sm:$0xff]   ;;  %v3869_v7 = vld [vmem:[#allocation5 + $0x44] ss:$8 sps:$4 sm:$0xff]  }
  0x88   : > { %649 = vmatprep.subr.bf16.mxu0 %v3863_v3  ;;  %v3871_v8 = vld [vmem:[#allocation5 + $0x40] ss:$8 sps:$4 sm:$0xff]   ;;  %v3872_v9 = vld [vmem:[#allocation5 + $0x34] ss:$8 sps:$4 sm:$0xff]   ;;  %v3874_v10 = vld [vmem:[#allocation5 + $0x30] ss:$8 sps:$4 sm:$0xff]  }
  0x89   : > { %v3875_v11 = vld [vmem:[#allocation5 + $0x24] ss:$8 sps:$4 sm:$0xff]   ;;  %v3877_v12 = vld [vmem:[#allocation5 + $0x20] ss:$8 sps:$4 sm:$0xff]   ;;  %v3878_v13 = vld [vmem:[#allocation5 + $0x14] ss:$8 sps:$4 sm:$0xff]  }
  0x8a   : > { %v3880_v14 = vld [vmem:[#allocation5 + $0x10] ss:$8 sps:$4 sm:$0xff]   ;;  %v3881_v16 = vld [vmem:[#allocation5 + $0x4] ss:$8 sps:$4 sm:$0xff]   ;;  %v3883_v20 = vld [vmem:[#allocation5] ss:$8 sps:$4 sm:$0xff]  }
  0x8b   : > { %650 = vmatpush1.bf16.msra.mxu0 %v3865_v4  ;;  %v3894_v15 = vld [vmem:[#allocation8 + $0x78] sm:$0xff]   ;;  %v3896_v18 = vld [vmem:[#allocation8 + $0x70] sm:$0xff]   ;;  %v3899_v31 = vld [vmem:[#allocation8 + $0x28] sm:$0xff]   ;;  %s3158_s5 = sshll.u32 %s4224_s16, 7  ;;  %v4535_v61 = vshrl.u32 %v846_v60, 7  ;;  %s5912_s4 = sld [smem:[#allocation52_spill]] }
  0x8c   : > { %651 = vmatprep.subr.bf16.mxu0 %v3866_v5  ;;  %v3895_v17 = vld [vmem:[#allocation8 + $0x38] sm:$0xff]   ;;  %3320 = vmatprep.subr.bf16.mxu1 %v3894_v15  ;;  %v3897_v19 = vld [vmem:[#allocation8 + $0x30] sm:$0xff]   ;;  %v3900_v32 = vld [vmem:[#allocation8 + $0x60] sm:$0xff]   ;;  %s3159_s6 = sadd.s32 4294967280, %s3158_s5  ;;  %s3129_s25 = sshll.u32 %s4489_s8, 7 }
  0x8d   : > { %3321 = vmatpush3.bf16.msra.mxu1 %v3895_v17  ;;  %v3884_v22 = vld [vmem:[%s4493_s26] sm:$0xff]   ;;  %v3885_v23 = vld [vmem:[%s4493_s26 + $0x8] sm:$0xff]   ;;  %v3886_v24 = vld [vmem:[%s4493_s26 + $0x10] sm:$0xff]   ;;  %v4539_v63 = vstv %s3159_s6  ;;  %v849_v4 = vadd.s32 16, %v4535_v61  ;;  %vm5703_vm8 = vcmp.lt.s32.totalorder %v4535_v61, 1  ;;  %vm5702_vm14 = vcmp.lt.s32.totalorder %v4535_v61, 7 }
  0x8e   : > { %3322 = vmatprep.subr.bf16.mxu1 %v3896_v18  ;;  %v3887_v25 = vld [vmem:[%s4493_s26 + $0x18] sm:$0xff]   ;;  %v3888_v26 = vld [vmem:[%s4493_s26 + $0x20] sm:$0xff]   ;;  %v3889_v27 = vld [vmem:[%s4493_s26 + $0x28] sm:$0xff]   ;;  %v870_v1 = vadd.s32 %v4539_v63, %v4535_v61  ;;  %s5558_s1 = scalar_lea.vmem [#allocation13], %s3129_s25  ;;  %s5925_s3 = sld [smem:[#allocation19_spill]] }
  0x8f   : > { %652 = vmatpush1.bf16.msra.mxu0 %v3868_v6  ;;  %v3890_v28 = vld [vmem:[%s4493_s26 + $0x30] sm:$0xff]   ;;  %v3891_v29 = vld [vmem:[%s4493_s26 + $0x38] sm:$0xff]   ;;  %v3892_v30 = vld [vmem:[%s4493_s26 + $0x40] sm:$0xff]   ;;  %v1014_v6 = vand.u32 15, %v4535_v61  ;;  %v1028_v17 = vand.u32 15, %v849_v4  ;;  %s3315_s24 = sshll.u32 %s4224_s16, 4 }
  0x90   : > { %653 = vmatprep.subr.bf16.mxu0 %v3869_v7  ;;  %v3901_v33 = vld [vmem:[#allocation8 + $0x20] sm:$0xff]   ;;  %v3893_v34 = vld [vmem:[%s4493_s26 + $0x48] sm:$0xff]   ;;  %v3904_v37 = vld [vmem:[#allocation8 + $0x50] sm:$0xff]   ;;  %vm890_vm0 = vcmp.ge.s32.totalorder %v870_v1, 0  ;;  %vm910_vm1 = vcmp.lt.s32.totalorder %v870_v1, 256  ;;  %v850_v7 = vadd.s32 24, %v4535_v61 }
  0x91   : > { %3323 = vmatpush3.bf16.msra.mxu1 %v3897_v19  ;;  %v3902_v35 = vld [vmem:[#allocation8 + $0x58] sm:$0xff]   ;;  %v3905_v38 = vld [vmem:[#allocation8 + $0x10] sm:$0xff]   ;;  %v3906_v39 = vld [vmem:[#allocation8 + $0x48] sm:$0xff]   ;;  %vm4560_vm5 = vcmp.eq.s32.totalorder %v1014_v6, 0  ;;  %vm4589_vm13 = vcmp.eq.s32.totalorder %v1028_v17, 0  ;;  %s2975_s5 = sshll.u32 %s5558_s1, 4  ;;  %s5619_s5 = int_to_ptr.vmem [resolvable:$true] %s2975_s5 }
  0x92   : > { %3324 = vmatprep.subr.bf16.mxu1 %v3898_v21  ;;  %v3903_v36 = vld [vmem:[#allocation8 + $0x18] sm:$0xff]   ;;  %v3907_v40 = vld [vmem:[#allocation8 + $0x8] sm:$0xff]   ;;  %v3908_v41 = vld [vmem:[#allocation8 + $0x40] sm:$0xff]   ;;  %s5930_s23 = sld [smem:[#allocation57_spill]]  ;;  %s2960_s10 = scalar_lea.sflag [#allocation4], %s4489_s8 }
  0x93   : > { %654 = vmatpush1.bf16.msra.mxu0 %v3871_v8  ;;  %v3909_v42 = vld [vmem:[#allocation8] sm:$0xff]   ;;  %v4531_v43 = vld [vmem:[#allocation8 + $0xb8] sm:$0xff]   ;;  %v3916_v46 = vld [vmem:[#allocation7 + $0x70] sm:$0xff]   ;;  %s4132_s21 = scalar_lea.vmem %s5619_s5, 2048  ;;  %s4253_s17 = smov [#allocation13]  }
  0x94   : > { %655 = vmatprep.subr.bf16.mxu0 %v3872_v9  ;;  %v3913_v44 = vld [vmem:[#allocation7 + $0x78] sm:$0xff]   ;;  %v3917_v47 = vld [vmem:[#allocation7 + $0x30] sm:$0xff]   ;;  %v3919_v48 = vld [vmem:[#allocation7 + $0x68] sm:$0xff]   ;;  %s3316_s19 = sshll.u32 %s5925_s3, 5  ;;  %p4133_p1 = scmp.ne.s32.totalorder %s5619_s5, %s4132_s21 }
  0x95   : > { %3325 = vmatpush3.bf16.msra.mxu1 %v3899_v31  ;;  %v3914_v45 = vld [vmem:[#allocation7 + $0x38] sm:$0xff]   ;;  %v3920_v49 = vld [vmem:[#allocation7 + $0x28] sm:$0xff]   ;;  %v3922_v50 = vld [vmem:[#allocation7 + $0x60] sm:$0xff]   ;;  %s2972_s26 = sadd.s32 %s3316_s19, %s3315_s24  ;;  %s4136_s28 = sshll.u32 %s4253_s17, 4  ;;  %s4137_s28 = int_to_ptr.vmem [resolvable:$false] %s4136_s28 }
  0x96   : > { %3326 = vmatprep.subr.bf16.mxu1 %v3900_v32  ;;  %v3923_v51 = vld [vmem:[#allocation7 + $0x20] sm:$0xff]   ;;  %v3925_v52 = vld [vmem:[#allocation7 + $0x58] sm:$0xff]   ;;  %v3927_v54 = vld [vmem:[#allocation7 + $0x50] sm:$0xff]   ;;  %s3317_s16 = sshll.u32 %s2972_s26, 7  ;;  %p4134_p3 = pnand %p4133_p1, %p4452_p8 }
  0x97   : > { %656 = vmatpush1.bf16.msra.mxu0 %v3874_v10  ;;  %v3926_v53 = vld [vmem:[#allocation7 + $0x18] sm:$0xff]   ;;  %v3928_v55 = vld [vmem:[#allocation7 + $0x10] sm:$0xff]   ;;  %v3930_v56 = vld [vmem:[#allocation7 + $0x48] sm:$0xff]   ;;  %s4138_s27 = scalar_lea.vmem %s4137_s28, 4096  ;;  %p4139_p13 = scmp.lt.s32.totalorder %s5619_s5, %s4137_s28 }
  0x98   : > { %657 = vmatprep.subr.bf16.mxu0 %v3875_v11  ;;  %v3931_v57 = vld [vmem:[#allocation7 + $0x8] sm:$0xff]   ;;  %v3932_v58 = vld [vmem:[#allocation7 + $0x40] sm:$0xff]   ;;  %v4537_v62 = vld [vmem:[#allocation10 + $0xb8] sm:$0xff]   ;;  %s5617_s29 = scalar_lea.hbm %s5930_s23, %s3317_s16  ;;  %p4135_p7 = pneg %p4134_p3 }
  0x99   : > { %3327 = vmatpush3.bf16.msra.mxu1 %v3901_v33  ;;  %v3933_v59 = vld [vmem:[#allocation7] sm:$0xff]   ;;  %vm4555_vm2 = vmand %vm890_vm0, %vm910_vm1  ;;  %v3911_v21 = vld [vmem:[#allocation8 + $0xb0] sm:$0xff]   ;;  %p4140_p12 = scmp.lt.s32.totalorder %s4138_s27, %s4132_s21 }
  0x9a   : > { %3328 = vmatprep.subr.bf16.mxu1 %v3902_v35  ;;  %v4548_v2 = vld [vmem:[%s5676_s2] ss:$0 sm:$0xff] }
  0x9b   : > { %658 = vmatpush1.bf16.msra.mxu0 %v3877_v12  ;;  %v872_v12 = vadd.s32 %v4539_v63, %v849_v4  ;;  %v854_v4 = vadd.s32 56, %v4535_v61  ;;  %p4141_p5 = por %p4140_p12, %p4139_p13 }
  0x9c   : > { %659 = vmatprep.subr.bf16.mxu0 %v3878_v13 }
  0x9d   : > { %3329 = vmatpush3.bf16.msra.mxu1 %v3903_v36  ;;  %vm892_vm9 = vcmp.ge.s32.totalorder %v872_v12, 0  ;;  %vm912_vm10 = vcmp.lt.s32.totalorder %v872_v12, 256  ;;  %p4142_p0 = pnand %p4141_p5, %p4135_p7 }
  0x9e   : > { %3330 = vmatprep.subr.bf16.mxu1 %v3904_v37  ;;  %vm4606_vm0 = vmand %vm892_vm9, %vm912_vm10  ;;  %v1035_v37 = vand.u32 15, %v850_v7 }
  0x9f   : > { %660 = vmatpush1.bf16.msra.mxu0 %v3880_v14 }
  0xa0   : > { %661 = vmatprep.subr.bf16.mxu0 %v3881_v16  ;;  %v873_v16 = vadd.s32 %v4539_v63, %v850_v7 }
  0xa1   : > { %3331 = vmatpush3.bf16.msra.mxu1 %v3905_v38 }
  0xa2   : > { %3332 = vmatprep.subr.bf16.mxu1 %v3906_v39  ;;  %vm893_vm12 = vcmp.ge.s32.totalorder %v873_v16, 0  ;;  %vm913_vm15 = vcmp.lt.s32.totalorder %v873_v16, 256 }
  0xa3   : > { %662 = vmatpush1.bf16.msra.mxu0 %v3883_v20  ;;  %vm4633_vm1 = vmand %vm893_vm12, %vm913_vm15  ;;  %v877_v20 = vadd.s32 %v4539_v63, %v854_v4 }
  0xa4   : > { %3400 = vmatprep.subr.bf16.mxu0 %v3913_v44 }
  0xa5   : > { %3333 = vmatpush3.bf16.msra.mxu1 %v3907_v40 }
  0xa6   : > { %680 = vmatmul.mubr.bf16.vlgmr.msra.gmra.mxu0 %v3884_v22  ;;  %3334 = vmatprep.subr.bf16.mxu1 %v3908_v41 }
  0xa7   : > { %687 = vmatprep.mubr.bf16.mxu0 %v4252_v0  ;;  %3401 = vmatpush3.bf16.msra.mxu0 %v3914_v45 }
  0xa8   : > { %3402 = vmatprep.subr.bf16.mxu0 %v3916_v46 }
  0xa9   : > { %3335 = vmatpush3.bf16.msra.mxu1 %v3909_v42 }
  0xaa   : > { %3576 = vmatprep.subr.bf16.mxu1 %v4531_v43 }
  0xab   : > { %3403 = vmatpush3.bf16.msra.mxu0 %v3917_v47 }
  0xac   : > { %3404 = vmatprep.subr.bf16.mxu0 %v3919_v48 }
  0xae   : > { %688 = vmatmul.mubr.bf16.gmra.mxu0 %v3885_v23 }
  0xaf   : > { %697 = vmatprep.mubr.bf16.mxu0 %v4252_v0  ;;  %3405 = vmatpush3.bf16.msra.mxu0 %v3920_v49 }
  0xb0   : > { %3406 = vmatprep.subr.bf16.mxu0 %v3922_v50 }
  0xb3   : > { %3407 = vmatpush3.bf16.msra.mxu0 %v3923_v51 }
  0xb4   : > { %3408 = vmatprep.subr.bf16.mxu0 %v3925_v52 }
  0xb6   : > { %698 = vmatmul.mubr.bf16.gmra.mxu0 %v3886_v24 }
  0xb7   : > { %707 = vmatprep.mubr.bf16.mxu0 %v4252_v0  ;;  %3409 = vmatpush3.bf16.msra.mxu0 %v3926_v53 }
  0xb8   : > { %3410 = vmatprep.subr.bf16.mxu0 %v3927_v54 }
  0xbb   : > { %3411 = vmatpush3.bf16.msra.mxu0 %v3928_v55 }
  0xbc   : > { %3412 = vmatprep.subr.bf16.mxu0 %v3930_v56 }
  0xbe   : > { %708 = vmatmul.mubr.bf16.gmra.mxu0 %v3887_v25  ;;  %v4583_v25 = vadd.s32 32, %v4535_v61 }
  0xbf   : > { %717 = vmatprep.mubr.bf16.mxu0 %v4252_v0  ;;  %3413 = vmatpush3.bf16.msra.mxu0 %v3931_v57  ;;  %v4654_v57 = vadd.s32 48, %v4535_v61 }
  0xc0   : > { %3414 = vmatprep.subr.bf16.mxu0 %v3932_v58  ;;  %v874_v41 = vadd.s32 %v4539_v63, %v4583_v25 }
  0xc3   : > { %3415 = vmatpush3.bf16.msra.mxu0 %v3933_v59 }
  0xc4   : > { %3640 = vmatprep.subr.bf16.mxu0 %v4537_v62 }
  0xc6   : > { %718 = vmatmul.mubr.bf16.gmra.mxu0 %v3888_v26 }
  0xc7   : > { %727 = vmatprep.mubr.bf16.mxu0 %v4252_v0 }
  0xce   : > { %728 = vmatmul.mubr.bf16.gmra.mxu0 %v3889_v27  ;;  %v4723_v27 = vadd.s32 64, %v4535_v61 }
  0xcf   : > { %737 = vmatprep.mubr.bf16.mxu0 %v4252_v0 }
  0xd6   : > { %738 = vmatmul.mubr.bf16.gmra.mxu0 %v3890_v28  ;;  %v852_v28 = vadd.s32 40, %v4535_v61 }
  0xd7   : > { %747 = vmatprep.mubr.bf16.mxu0 %v4252_v0 }
  0xd8   : > { %v875_v44 = vadd.s32 %v4539_v63, %v852_v28  ;;  %v1049_v9 = vand.u32 15, %v852_v28 }
  0xde   : > { %748 = vmatmul.mubr.bf16.gmra.mxu0 %v3891_v29 }
  0xdf   : > { %757 = vmatprep.mubr.bf16.mxu0 %v4252_v0 }
  0xe6   : > { %758 = vmatmul.mubr.bf16.gmra.mxu0 %v3892_v30 }
  0xe7   : > { %767 = vmatprep.mubr.bf16.mxu0 %v4252_v0  ;;  %v848_v0 = vadd.s32 8, %v4535_v61 }
  0xe9   : > { %v871_v3 = vadd.s32 %v4539_v63, %v848_v0  ;;  %v1021_v11 = vand.u32 15, %v848_v0 }
  0xeb   : > { %vm891_vm3 = vcmp.ge.s32.totalorder %v871_v3, 0  ;;  %vm911_vm4 = vcmp.lt.s32.totalorder %v871_v3, 256  ;;  %vm4574_vm7 = vcmp.eq.s32.totalorder %v1021_v11, 15  ;;  %v876_v11 = vadd.s32 %v4539_v63, %v4654_v57 }
  0xec   : > { %vm4570_vm6 = vmand %vm891_vm3, %vm911_vm4  ;;  %vm4643_vm3 = vcmp.eq.s32.totalorder %v1035_v37, 15  ;;  %vm914_vm4 = vcmp.lt.s32.totalorder %v874_v41, 256  ;;  %v856_v37 = vadd.s32 72, %v4535_v61 }
  0xed   : > { %vm3232_vm11 = vmpackc.low %vm4570_vm6, %vm4555_vm2  ;;  %vm896_vm12 = vcmp.ge.s32.totalorder %v876_v11, 0 }
  0xee   : > { %768 = vmatmul.mubr.bf16.gmra.mxu0 %v3893_v34 }
 0x166   : > { %v681_v5 = vpop.f32.mrf.mxu0 }
 0x167   : > { %v783_v8 = vadd.f32 %v4548_v2, %v681_v5 }
 0x168   : > { %v683_v10 = vpop.f32.mrf.mxu0 }
 0x169   : > { %v803_v13 = vmax.f32 %v783_v8, 0.0 }
 0x16a   : > { %v684_v15 = vpop.f32.mrf.mxu0 }
 0x16b   : > { %v4567_v18 = vsel %vm4555_vm2, %v803_v13, 0.0  ;;  %v784_v19 = vadd.f32 %v4548_v2, %v684_v15  ;;  %vm894_vm2 = vcmp.ge.s32.totalorder %v874_v41, 0 }
 0x16c   : > { %v686_v22 = vpop.f32.mrf.mxu0  ;;  %v1390_v23 = vsel %vm4560_vm5, 0.0, %v4567_v18  ;;  %v5692_v38 = vrot.slane %v4567_v18, 7  ;;  %vm5693_vm5 = vmpackc.low %vm4633_vm1, %vm4606_vm0 }
 0x16d   : > { %v804_v24 = vmax.f32 %v784_v19, 0.0  ;;  %v4598_v32 = vrot.slane %v1390_v23, 1  ;;  %vm4678_vm9 = vmand %vm894_vm2, %vm914_vm4  ;;  %vm897_vm2 = vcmp.ge.s32.totalorder %v877_v20, 0 }
 0x16e   : > { %v689_v26 = vpop.f32.mrf.mxu0 }
 0x16f   : > { %v991_v29 = vsel %vm4570_vm6, %v804_v24, 0.0  ;;  %v3233_v30 = vpack.c.bf16 %v804_v24, %v803_v13  ;;  %v785_v31 = vadd.f32 %v4548_v2, %v689_v26  ;;  %vm895_vm6 = vcmp.ge.s32.totalorder %v875_v44, 0 }
 0x170   : > { %v1311_v33 = vsel %vm4574_vm7, 0.0, %v991_v29  ;;  %v1472_v34 = vrot.slane %v991_v29, 1  ;;  %v4602_v35 = vpop.f32.mrf.mxu0  ;;  %vm915_vm7 = vcmp.lt.s32.totalorder %v875_v44, 256 }
 0x171   : > { %5759 = vst [vmem:[#allocation23_spill] sm:$0xff] %v4602_v35  ;;  %v1411_v39 = vrot.slane %v1311_v33, 7  ;;  %v805_v40 = vmax.f32 %v785_v31, 0.0  ;;  %3234 = vmatprep.mubr.msk.bf16.mxu0 %vm3232_vm11, %v3233_v30  ;;  %vm4692_vm10 = vmand %vm895_vm6, %vm915_vm7  ;;  %vm4709_vm11 = vcmp.eq.s32.totalorder %v1049_v9, 15 }
 0x172   : > { %v693_v42 = vpop.f32.mrf.mxu0  ;;  %v4622_v45 = vsel %vm5702_vm14, %v4598_v32, %v1472_v34  ;;  %vm4718_vm15 = vmpackc.low %vm4692_vm10, %vm4678_vm9 }
 0x173   : > { %5762 = vst [vmem:[#allocation24_spill] sm:$0xff] %v4622_v45  ;;  %v4628_v46 = vsel %vm5703_vm8, %v5692_v38, %v1411_v39  ;;  %v786_v47 = vadd.f32 %v4548_v2, %v693_v42  ;;  %v992_v49 = vsel %vm4606_vm0, %v805_v40, 0.0 }
 0x174   : > { %v4639_v50 = vpop.f32.mrf.mxu0  ;;  %v1392_v51 = vsel %vm4589_vm13, 0.0, %v992_v49  ;;  %v1412_v56 = vrot.slane %v992_v49, 7  ;;  %vm916_vm13 = vcmp.lt.s32.totalorder %v876_v11, 256 }
 0x175   : > { %5765 = vst [vmem:[#allocation25_spill] sm:$0xff] %v4639_v50  ;;  %v806_v52 = vmax.f32 %v786_v47, 0.0  ;;  %v4647_v54 = vrot.slane %v1392_v51, 1  ;;  %vm4742_vm4 = vmand %vm896_vm12, %vm916_vm13  ;;  %v878_v47 = vadd.s32 %v4539_v63, %v4723_v27 }
 0x176   : > { %v699_v55 = vpop.f32.mrf.mxu0  ;;  %v1448_v15 = vsel %vm5703_vm8, %v1411_v39, %v1412_v56  ;;  %v3912_v39 = vld [vmem:[#allocation8 + $0xa8] sm:$0xff]  }
 0x177   : > { %v787_v58 = vadd.f32 %v4548_v2, %v699_v55  ;;  %v4659_v59 = vsel %vm4633_vm1, %v806_v52, 0.0  ;;  %v4661_v60 = vpack.c.bf16 %v806_v52, %v805_v40  ;;  %v4666_v0 = vsel %vm5702_vm14, %v1472_v34, %v4647_v54 }
 0x178   : > { %v4668_v1 = vpop.f32.mrf.mxu0  ;;  %v1313_v3 = vsel %vm4643_vm3, 0.0, %v4659_v59  ;;  %vm917_vm3 = vcmp.lt.s32.totalorder %v877_v20, 256 }
 0x179   : > { %5768 = vst [vmem:[#allocation26_spill] sm:$0xff] %v4668_v1  ;;  %v807_v6 = vmax.f32 %v787_v58, 0.0  ;;  %v1413_v8 = vrot.slane %v1313_v3, 7  ;;  %3186 = vmatprep.mubr.msk.bf16.mxu1 %vm5693_vm5, %v4661_v60  ;;  %vm4752_vm6 = vmand %vm897_vm2, %vm917_vm3  ;;  %v879_v3 = vadd.s32 %v4539_v63, %v856_v37 }
 0x17a   : > { %v703_v10 = vpop.f32.mrf.mxu0 }
 0x17b   : > { %v788_v12 = vadd.f32 %v4548_v2, %v703_v10  ;;  %v1447_v14 = vsel %vm5703_vm8, %v1412_v56, %v1413_v8  ;;  %v4702_v16 = vsel %vm4678_vm9, %v807_v6, 0.0  ;;  %vm898_vm9 = vcmp.ge.s32.totalorder %v878_v47, 0 }
 0x17c   : > { %v4704_v17 = vpop.f32.mrf.mxu0  ;;  %v4706_v19 = vpack.c.bf16 %v1447_v14, %v1448_v15  ;;  %v1414_v28 = vrot.slane %v4702_v16, 7  ;;  %v4783_v10 = vadd.s32 80, %v4535_v61  ;;  %vm899_vm12 = vcmp.ge.s32.totalorder %v879_v3, 0 }
 0x17d   : > { %5773 = vst [vmem:[#allocation27_spill] sm:$0xff] %v4704_v17  ;;  %v808_v22 = vmax.f32 %v788_v12, 0.0  ;;  %vm919_vm13 = vcmp.lt.s32.totalorder %v879_v3, 256 }
 0x17e   : > { %v709_v24 = vpop.f32.mrf.mxu0  ;;  %1795 = vmatmul.mubr.bf16.vlgmr.msra.gmra.mxu1 %v4706_v19  ;;  %v1446_v53 = vsel %vm5703_vm8, %v1413_v8, %v1414_v28  ;;  %vm4811_vm3 = vmand %vm899_vm12, %vm919_vm13 }
 0x17f   : > { %v4728_v29 = vsel %vm4692_vm10, %v808_v22, 0.0  ;;  %v4730_v30 = vpack.c.bf16 %v808_v22, %v807_v6  ;;  %v789_v31 = vadd.f32 %v4548_v2, %v709_v24  ;;  %3577 = vmatpush3.bf16.msra.mxu1 %v4531_v43  ;;  %v1063_v43 = vand.u32 15, %v854_v4  ;;  %v3915_v4 = vld [vmem:[#allocation8 + $0xa0] sm:$0xff]   ;;  %v3918_v22 = vld [vmem:[#allocation8 + $0x98] sm:$0xff]  }
 0x180   : > { %v1315_v33 = vsel %vm4709_vm11, 0.0, %v4728_v29  ;;  %v4737_v34 = vpop.f32.mrf.mxu0  ;;  %3578 = vmatprep.subr.bf16.mxu1 %v3911_v21  ;;  %vm918_vm10 = vcmp.lt.s32.totalorder %v878_v47, 256  ;;  %vm4778_vm11 = vmpackc.low %vm4752_vm6, %vm4742_vm4 }
 0x181   : > { %5778 = vst [vmem:[#allocation28_spill] sm:$0xff] %v4737_v34  ;;  %v1415_v40 = vrot.slane %v1315_v33, 7  ;;  %v809_v41 = vmax.f32 %v789_v31, 0.0  ;;  %3189 = vmatprep.mubr.msk.bf16.mxu1 %vm4718_vm15, %v4730_v30  ;;  %vm4769_vm7 = vcmp.eq.s32.totalorder %v1063_v43, 15  ;;  %vm4801_vm2 = vmand %vm898_vm9, %vm918_vm10  ;;  %v1077_v31 = vand.u32 15, %v856_v37 }
 0x182   : > { %v713_v44 = vpop.f32.mrf.mxu0  ;;  %vm4837_vm9 = vmpackc.low %vm4811_vm3, %vm4801_vm2 }
 0x183   : > { %v790_v49 = vadd.f32 %v4548_v2, %v713_v44  ;;  %v1445_v52 = vsel %vm5703_vm8, %v1414_v28, %v1415_v40  ;;  %3579 = vmatpush3.bf16.msra.mxu1 %v3911_v21  ;;  %v4762_v55 = vsel %vm4742_vm4, %v809_v41, 0.0  ;;  %v858_v21 = vadd.s32 88, %v4535_v61 }
 0x184   : > { %v4764_v56 = vpop.f32.mrf.mxu0  ;;  %v4766_v58 = vpack.c.bf16 %v1445_v52, %v1446_v53  ;;  %3580 = vmatprep.subr.bf16.mxu1 %v3912_v39  ;;  %v1416_v11 = vrot.slane %v4762_v55, 7  ;;  %v3921_v52 = vld [vmem:[#allocation8 + $0x90] sm:$0xff]   ;;  %vm4828_vm4 = vcmp.eq.s32.totalorder %v1077_v31, 15  ;;  %v860_v31 = vadd.s32 104, %v4535_v61 }
 0x185   : > { %5783 = vst [vmem:[#allocation29_spill] sm:$0xff] %v4764_v56  ;;  %v810_v6 = vmax.f32 %v790_v49, 0.0  ;;  %v881_v51 = vadd.s32 %v4539_v63, %v858_v21  ;;  %v4917_v56 = vld [vmem:[#allocation7 + $0xb8] sm:$0xff]  }
 0x186   : > { %v719_v9 = vpop.f32.mrf.mxu0  ;;  %1803 = vmatmul.mubr.bf16.gmra.mxu1 %v4766_v58  ;;  %v1444_v44 = vsel %vm5703_vm8, %v1415_v40, %v1416_v11  ;;  %v1105_v38 = vand.u32 15, %v860_v31 }
 0x187   : > { %v4788_v12 = vsel %vm4752_vm6, %v810_v6, 0.0  ;;  %v4790_v13 = vpack.c.bf16 %v810_v6, %v809_v41  ;;  %v791_v14 = vadd.f32 %v4548_v2, %v719_v9  ;;  %3581 = vmatpush3.bf16.msra.mxu1 %v3912_v39  ;;  %v880_v39 = vadd.s32 %v4539_v63, %v4783_v10 }
 0x188   : > { %v1317_v15 = vsel %vm4769_vm7, 0.0, %v4788_v12  ;;  %v4796_v20 = vpop.f32.mrf.mxu0  ;;  %3582 = vmatprep.subr.bf16.mxu1 %v3915_v4  ;;  %vm901_vm10 = vcmp.ge.s32.totalorder %v881_v51, 0  ;;  %vm921_vm12 = vcmp.lt.s32.totalorder %v881_v51, 256 }
 0x189   : > { %5788 = vst [vmem:[#allocation30_spill] sm:$0xff] %v4796_v20  ;;  %v1417_v23 = vrot.slane %v1317_v15, 7  ;;  %v811_v24 = vmax.f32 %v791_v14, 0.0  ;;  %3192 = vmatprep.mubr.msk.bf16.mxu1 %vm4778_vm11, %v4790_v13  ;;  %vm900_vm6 = vcmp.ge.s32.totalorder %v880_v39, 0  ;;  %vm920_vm7 = vcmp.lt.s32.totalorder %v880_v39, 256 }
 0x18a   : > { %v723_v33 = vpop.f32.mrf.mxu0  ;;  %vm4860_vm13 = vmand %vm900_vm6, %vm920_vm7  ;;  %v4993_v20 = vadd.s32 144, %v4535_v61 }
 0x18b   : > { %v792_v41 = vadd.f32 %v4548_v2, %v723_v33  ;;  %v1443_v43 = vsel %vm5703_vm8, %v1416_v11, %v1417_v23  ;;  %3583 = vmatpush3.bf16.msra.mxu1 %v3915_v4  ;;  %v4821_v37 = vsel %vm4801_vm2, %v811_v24, 0.0  ;;  %v4842_v4 = vadd.s32 96, %v4535_v61  ;;  %v3924_v33 = vld [vmem:[#allocation8 + $0x88] sm:$0xff]   ;;  %vm4870_vm2 = vmand %vm901_vm10, %vm921_vm12 }
 0x18c   : > { %v4823_v47 = vpop.f32.mrf.mxu0  ;;  %v4825_v49 = vpack.c.bf16 %v1443_v43, %v1444_v44  ;;  %3584 = vmatprep.subr.bf16.mxu1 %v3918_v22  ;;  %v1418_v7 = vrot.slane %v4821_v37, 7  ;;  %vm4896_vm7 = vmpackc.low %vm4870_vm2, %vm4860_vm13 }
 0x18d   : > { %5793 = vst [vmem:[#allocation31_spill] sm:$0xff] %v4823_v47  ;;  %v812_v53 = vmax.f32 %v792_v41, 0.0  ;;  %v882_v44 = vadd.s32 %v4539_v63, %v4842_v4 }
 0x18e   : > { %v729_v6 = vpop.f32.mrf.mxu0  ;;  %1811 = vmatmul.mubr.bf16.gmra.mxu1 %v4825_v49  ;;  %v1442_v3 = vsel %vm5703_vm8, %v1417_v23, %v1418_v7  ;;  %v5807_v23 = vmov 0 }
 0x18f   : > { %v4847_v9 = vsel %vm4811_vm3, %v812_v53, 0.0  ;;  %v4849_v11 = vpack.c.bf16 %v812_v53, %v811_v24  ;;  %v793_v14 = vadd.f32 %v4548_v2, %v729_v6  ;;  %3585 = vmatpush3.bf16.msra.mxu1 %v3918_v22  ;;  %v1091_v22 = vand.u32 15, %v858_v21 }
 0x190   : > { %v1319_v15 = vsel %vm4828_vm4, 0.0, %v4847_v9  ;;  %v4855_v28 = vpop.f32.mrf.mxu0  ;;  %3586 = vmatprep.subr.bf16.mxu1 %v3921_v52  ;;  %vm902_vm4 = vcmp.ge.s32.totalorder %v882_v44, 0  ;;  %vm922_vm6 = vcmp.lt.s32.totalorder %v882_v44, 256  ;;  %v5808_v23 = vsel %vm4896_vm7, 4294967295, %v5807_v23 }
 0x191   : > { %5798 = vst [vmem:[#allocation32_spill] sm:$0xff] %v4855_v28  ;;  %v1419_v41 = vrot.slane %v1319_v15, 7  ;;  %v813_v42 = vmax.f32 %v793_v14, 0.0  ;;  %3195 = vmatprep.mubr.msk.bf16.mxu1 %vm4837_vm9, %v4849_v11  ;;  %v883_v15 = vadd.s32 %v4539_v63, %v860_v31  ;;  %vm4887_vm3 = vcmp.eq.s32.totalorder %v1091_v22, 15  ;;  %5809 = vst [vmem:[#allocation35_spill] sm:$0xff] %v5808_v23 }
 0x192   : > { %v733_v43 = vpop.f32.mrf.mxu0 }
 0x193   : > { %v794_v51 = vadd.f32 %v4548_v2, %v733_v43  ;;  %v1441_v39 = vsel %vm5703_vm8, %v1418_v7, %v1419_v41  ;;  %3587 = vmatpush3.bf16.msra.mxu1 %v3921_v52  ;;  %v4880_v21 = vsel %vm4860_vm13, %v813_v42, 0.0  ;;  %v3929_v43 = vld [vmem:[#allocation8 + $0x80] sm:$0xff]   ;;  %v4901_v52 = vadd.s32 112, %v4535_v61  ;;  %vm4921_vm13 = vmand %vm902_vm4, %vm922_vm6 }
 0x194   : > { %v4882_v6 = vpop.f32.mrf.mxu0  ;;  %v4884_v14 = vpack.c.bf16 %v1441_v39, %v1442_v3  ;;  %3588 = vmatprep.subr.bf16.mxu1 %v3924_v33  ;;  %v1420_v7 = vrot.slane %v4880_v21, 7  ;;  %vm903_vm10 = vcmp.ge.s32.totalorder %v883_v15, 0  ;;  %vm923_vm12 = vcmp.lt.s32.totalorder %v883_v15, 256 }
 0x195   : > { %5803 = vst [vmem:[#allocation33_spill] sm:$0xff] %v4882_v6  ;;  %v814_v5 = vmax.f32 %v794_v51, 0.0  ;;  %v862_v6 = vadd.s32 120, %v4535_v61  ;;  %v1112_v45 = vand.u32 15, %v4901_v52 }
 0x196   : > { %5804 = vst [vmem:[#allocation34_spill] sm:$0xff] %v4884_v14  ;;  %v739_v28 = vpop.f32.mrf.mxu0  ;;  %1819 = vmatmul.mubr.bf16.gmra.mxu1 %v4884_v14 }
 0x197   : > { %v4906_v22 = vsel %vm4870_vm2, %v814_v5, 0.0  ;;  %v4908_v51 = vpack.c.bf16 %v814_v5, %v813_v42  ;;  %v795_v39 = vadd.f32 %v4548_v2, %v739_v28  ;;  %3589 = vmatpush3.bf16.msra.mxu1 %v3924_v33  ;;  %v884_v33 = vadd.s32 %v4539_v63, %v4901_v52  ;;  %vm4931_vm2 = vmand %vm903_vm10, %vm923_vm12 }
 0x198   : > { %v1321_v24 = vsel %vm4887_vm3, 0.0, %v4906_v22  ;;  %v4914_v3 = vpop.f32.mrf.mxu0  ;;  %3590 = vmatprep.subr.bf16.mxu1 %v3929_v43  ;;  %vm4949_vm3 = vcmp.eq.s32.totalorder %v1105_v38, 15  ;;  %vm4961_vm10 = vmpackc.low %vm4931_vm2, %vm4921_vm13  ;;  %v4966_v38 = vadd.s32 128, %v4535_v61  ;;  %v1119_v17 = vand.u32 15, %v862_v6 }
 0x199   : > { %5810 = vst [vmem:[#allocation36_spill] sm:$0xff] %v4908_v51  ;;  %5811 = vst [vmem:[#allocation37_spill] sm:$0xff] %v4914_v3  ;;  %v1421_v53 = vrot.slane %v1321_v24, 7  ;;  %v815_v47 = vmax.f32 %v795_v39, 0.0  ;;  %3198 = vmatprep.mubr.msk.bf16.mxu1 %vm4896_vm7, %v4908_v51  ;;  %v1440_v39 = vsel %vm5703_vm8, %v1419_v41, %v1420_v7  ;;  %v4954_v41 = vadd.s32 136, %v4535_v61 }
 0x19a   : > { %v743_v28 = vpop.f32.mrf.mxu0  ;;  %vm904_vm4 = vcmp.ge.s32.totalorder %v884_v33, 0  ;;  %vm924_vm6 = vcmp.lt.s32.totalorder %v884_v33, 256  ;;  %v4998_v33 = vadd.s32 152, %v4535_v61 }
 0x19b   : > { %v796_v42 = vadd.f32 %v4548_v2, %v743_v28  ;;  %v1439_v44 = vsel %vm5703_vm8, %v1420_v7, %v1421_v53  ;;  %3591 = vmatpush3.bf16.msra.mxu1 %v3929_v43  ;;  %v4941_v31 = vsel %vm4921_vm13, %v815_v47, 0.0  ;;  %v885_v28 = vadd.s32 %v4539_v63, %v862_v6  ;;  %vm4983_vm5 = vmand %vm904_vm4, %vm924_vm6 }
 0x19c   : > { %v4943_v24 = vpop.f32.mrf.mxu0  ;;  %v4945_v3 = vpack.c.bf16 %v1439_v44, %v1440_v39  ;;  %3608 = vmatprep.subr.bf16.mxu1 %v4917_v56  ;;  %v5820_v7 = vmov 0  ;;  %v886_v6 = vadd.s32 %v4539_v63, %v4966_v38 }
 0x19d   : > { %5816 = vst [vmem:[#allocation38_spill] sm:$0xff] %v4943_v24  ;;  %v816_v34 = vmax.f32 %v796_v42, 0.0  ;;  %v5821_v7 = vsel %vm4961_vm10, 4294967295, %v5820_v7  ;;  %v1422_v42 = vrot.slane %v4941_v31, 7  ;;  %vm905_vm12 = vcmp.ge.s32.totalorder %v885_v28, 0 }
 0x19e   : > { %5817 = vst [vmem:[#allocation39_spill] sm:$0xff] %v4945_v3  ;;  %v749_v43 = vpop.f32.mrf.mxu0  ;;  %1827 = vmatmul.mubr.bf16.gmra.mxu1 %v4945_v3  ;;  %5822 = vst [vmem:[#allocation40_spill] sm:$0xff] %v5821_v7  ;;  %vm925_vm13 = vcmp.lt.s32.totalorder %v885_v28, 256 }
 0x19f   : > { %v4971_v44 = vsel %vm4931_vm2, %v816_v34, 0.0  ;;  %v4973_v39 = vpack.c.bf16 %v816_v34, %v815_v47  ;;  %v797_v24 = vadd.f32 %v4548_v2, %v749_v43  ;;  %v887_v34 = vadd.s32 %v4539_v63, %v4954_v41  ;;  %vm5001_vm2 = vmand %vm905_vm12, %vm925_vm13 }
 0x1a0   : > { %v1323_v5 = vsel %vm4949_vm3, 0.0, %v4971_v44  ;;  %v4979_v50 = vpop.f32.mrf.mxu0  ;;  %vm5014_vm3 = vcmp.eq.s32.totalorder %v1119_v17, 15  ;;  %vm906_vm12 = vcmp.ge.s32.totalorder %v886_v6, 0  ;;  %vm926_vm13 = vcmp.lt.s32.totalorder %v886_v6, 256  ;;  %vm5029_vm14 = vmpackc.low %vm5001_vm2, %vm4983_vm5 }
 0x1a1   : > { %5823 = vst [vmem:[#allocation41_spill] sm:$0xff] %v4973_v39  ;;  %5824 = vst [vmem:[#allocation42_spill] sm:$0xff] %v4979_v50  ;;  %v1423_v35 = vrot.slane %v1323_v5, 7  ;;  %v817_v1 = vmax.f32 %v797_v24, 0.0  ;;  %3201 = vmatprep.mubr.msk.bf16.mxu1 %vm4961_vm10, %v4973_v39  ;;  %v1438_v5 = vsel %vm5703_vm8, %v1421_v53, %v1422_v42  ;;  %v1042_v50 = vand.u32 15, %v4583_v25 }
 0x1a2   : > { %v753_v47 = vpop.f32.mrf.mxu0  ;;  %vm907_vm4 = vcmp.ge.s32.totalorder %v887_v34, 0  ;;  %vm927_vm6 = vcmp.lt.s32.totalorder %v887_v34, 256  ;;  %v888_v53 = vadd.s32 %v4539_v63, %v4993_v20  ;;  %v5833_v25 = vmov 0 }
 0x1a3   : > { %v798_v24 = vadd.f32 %v4548_v2, %v753_v47  ;;  %v1437_v43 = vsel %vm5703_vm8, %v1422_v42, %v1423_v35  ;;  %v5012_v7 = vsel %vm4983_vm5, %v817_v1, 0.0  ;;  %v5834_v25 = vsel %vm5029_vm14, 4294967295, %v5833_v25  ;;  %vm5054_vm5 = vmand %vm907_vm4, %vm927_vm6 }
 0x1a4   : > { %v5018_v47 = vpop.f32.mrf.mxu0  ;;  %v5020_v3 = vpack.c.bf16 %v1437_v43, %v1438_v5  ;;  %5835 = vst [vmem:[#allocation45_spill] sm:$0xff] %v5834_v25  ;;  %v889_v17 = vadd.s32 %v4539_v63, %v4998_v33  ;;  %vm5043_vm8 = vcmp.eq.s32.totalorder %v1042_v50, 0  ;;  %vm928_vm10 = vcmp.lt.s32.totalorder %v888_v53, 256  ;;  %v3969_v50 = vld [vmem:[#allocation11 + $0x20] sm:$0xff]  }
 0x1a5   : > { %5831 = vst [vmem:[#allocation43_spill] sm:$0xff] %v5018_v47  ;;  %v818_v23 = vmax.f32 %v798_v24, 0.0  ;;  %v1424_v24 = vrot.slane %v5012_v7, 7  ;;  %v1056_v39 = vand.u32 15, %v4654_v57  ;;  %v1070_v34 = vand.u32 15, %v4723_v27 }
 0x1a6   : > { %5832 = vst [vmem:[#allocation44_spill] sm:$0xff] %v5020_v3  ;;  %v759_v42 = vpop.f32.mrf.mxu0  ;;  %1835 = vmatmul.mubr.bf16.gmra.mxu1 %v5020_v3  ;;  %vm909_vm4 = vcmp.ge.s32.totalorder %v889_v17, 0  ;;  %vm929_vm6 = vcmp.lt.s32.totalorder %v889_v17, 256  ;;  %v1098_v25 = vand.u32 15, %v4842_v4 }
 0x1a7   : > { %v5038_v43 = vsel %vm5001_vm2, %v818_v23, 0.0  ;;  %v5040_v5 = vpack.c.bf16 %v818_v23, %v817_v1  ;;  %v799_v47 = vadd.f32 %v4548_v2, %v759_v42  ;;  %v1133_v1 = vand.u32 15, %v4954_v41  ;;  %vm5061_vm2 = vmand %vm906_vm12, %vm926_vm13 }
 0x1a8   : > { %v1325_v3 = vsel %vm5014_vm3, 0.0, %v5038_v43  ;;  %v5050_v51 = vpop.f32.mrf.mxu0  ;;  %vm908_vm3 = vcmp.ge.s32.totalorder %v888_v53, 0  ;;  %vm5844_vm12 = vcmp.lt.s32.totalorder %v4535_v61, 1 }
 0x1a9   : > { %5836 = vst [vmem:[#allocation46_spill] sm:$0xff] %v5040_v5  ;;  %5839 = vst [vmem:[#allocation47_spill] sm:$0xff] %v5050_v51  ;;  %v1425_v23 = vrot.slane %v1325_v3, 7  ;;  %v819_v28 = vmax.f32 %v799_v47, 0.0  ;;  %3204 = vmatprep.mubr.msk.bf16.mxu1 %vm5029_vm14, %v5040_v5  ;;  %v1394_v3 = vsel %vm5043_vm8, 0.0, %v4702_v16  ;;  %v5847_v16 = vmov 0 }
 0x1aa   : > { %v763_v42 = vpop.f32.mrf.mxu0  ;;  %vm5845_vm13 = vmmov %vm5844_vm12  ;;  %vm5103_vm14 = vcmp.eq.s32.totalorder %v1056_v39, 0 }
 0x1ab   : > { %v800_v41 = vadd.f32 %v4548_v2, %v763_v42  ;;  %v1435_v6 = vsel %vm5844_vm12, %v1424_v24, %v1425_v23  ;;  %v1436_v47 = vsel %vm5845_vm13, %v1423_v35, %v1424_v24  ;;  %v5084_v57 = vsel %vm5061_vm2, %v819_v28, 0.0  ;;  %vm5088_vm8 = vmand %vm908_vm3, %vm928_vm10 }
 0x1ac   : > { %v5086_v27 = vpop.f32.mrf.mxu0  ;;  %v5848_v16 = vsel %vm5088_vm8, 4294967295, %v5847_v16  ;;  %v5092_v53 = vpack.c.bf16 %v1435_v6, %v1436_v47  ;;  %vm5094_vm12 = vcmp.eq.s32.totalorder %v1133_v1, 15  ;;  %v1140_v24 = vand.u32 15, %v4993_v20  ;;  %vm5099_vm13 = vmand %vm909_vm4, %vm929_vm6 }
 0x1ad   : > { %5846 = vst [vmem:[#allocation48_spill] sm:$0xff] %v5086_v27  ;;  %5849 = vst [vmem:[#allocation49_spill] sm:$0xff] %v5848_v16  ;;  %v820_v17 = vmax.f32 %v800_v41, 0.0  ;;  %v1475_v42 = vrot.slane %v1394_v3, 1  ;;  %vm5107_vm10 = vcmp.eq.s32.totalorder %v1070_v34, 0  ;;  %v1147_v1 = vand.u32 15, %v4998_v33 }
 0x1ae   : > { %5850 = vst [vmem:[#allocation50_spill] sm:$0xff] %v5092_v53  ;;  %v769_v41 = vpop.f32.mrf.mxu0  ;;  %1843 = vmatmul.mubr.bf16.gmra.mxu1 %v5092_v53  ;;  %v1426_v20 = vrot.slane %v5084_v57, 7  ;;  %v1474_v6 = vrot.slane %v4659_v59, 1  ;;  %v1084_v47 = vand.u32 15, %v4783_v10  ;;  %vm5131_vm4 = vcmp.eq.s32.totalorder %v1140_v24, 0  ;;  %vm5861_vm6 = vmpackc.low %vm5054_vm5, %vm5061_vm2 }
 0x1af   : > { %v5120_v39 = vsel %vm5054_vm5, %v820_v17, 0.0  ;;  %v5122_v34 = vpack.c.bf16 %v820_v17, %v819_v28  ;;  %v801_v3 = vadd.f32 %v4548_v2, %v769_v41  ;;  %v1396_v59 = vsel %vm5103_vm14, 0.0, %v4762_v55 }
 0x1b0   : > { %v1327_v33 = vsel %vm5094_vm12, 0.0, %v5120_v39  ;;  %v771_v53 = vpop.f32.mrf.mxu0  ;;  %v1398_v10 = vsel %vm5107_vm10, 0.0, %v4821_v37  ;;  %vm5147_vm12 = vcmp.eq.s32.totalorder %v1147_v1, 15  ;;  %vm5864_vm3 = vcmp.lt.s32.totalorder %v4535_v61, 7 }
 0x1b1   : > { %v1427_v5 = vrot.slane %v1327_v33, 7  ;;  %v821_v14 = vmax.f32 %v801_v3, 0.0  ;;  %3207 = vmatprep.mubr.msk.bf16.mxu1 %vm5861_vm6, %v5122_v34  ;;  %v1507_v53 = vsel %vm5864_vm3, %v1474_v6, %v1475_v42  ;;  %vm5865_vm6 = vcmp.lt.s32.totalorder %v4535_v61, 1  ;;  %vm5867_vm10 = vmmov %vm5864_vm3 }
 0x1b2   : > { %v772_v4 = vpop.f32.mrf.mxu0  ;;  %vm5866_vm14 = vmmov %vm5865_vm6  ;;  %v1476_v37 = vrot.slane %v4728_v29, 1  ;;  %v1508_v41 = vsel %vm5867_vm10, %v4647_v54, %v1474_v6  ;;  %v1477_v3 = vrot.slane %v1396_v59, 1  ;;  %v1479_v16 = vrot.slane %v1398_v10, 1  ;;  %v3945_v54 = vld [vmem:[#allocation10 + $0x70] sm:$0xff]  }
 0x1b3   : > { %v1008_v17 = vsel %vm5088_vm8, %v821_v14, 0.0  ;;  %v802_v35 = vadd.f32 %v4548_v2, %v772_v4  ;;  %v1433_v55 = vsel %vm5865_vm6, %v1426_v20, %v1427_v5  ;;  %v1434_v51 = vsel %vm5866_vm14, %v1425_v23, %v1426_v20 }
 0x1b4   : > { %v1428_v27 = vrot.slane %v1008_v17, 7  ;;  %v5161_v24 = vpack.c.bf16 %v1433_v55, %v1434_v51  ;;  %v774_v1 = vpop.f32.mrf.mxu0  ;;  %v1408_v2 = vsel %vm5131_vm4, 0.0, %v1008_v17  ;;  %v5168_v4 = vpack.c.bf16 %v1507_v53, %v1508_v41  ;;  %vm5872_vm4 = vmmov %vm5867_vm10 }
 0x1b5   : > { %v822_v33 = vmax.f32 %v802_v35, 0.0  ;;  %vm5170_vm3 = vcmp.eq.s32.totalorder %v1084_v47, 0  ;;  %vm5179_vm14 = vcmp.eq.s32.totalorder %v1098_v25, 0  ;;  %v1478_v47 = vrot.slane %v4788_v12, 1  ;;  %vm5873_vm10 = vmmov %vm5872_vm4 }
 0x1b6   : > { %1851 = vmatmul.mubr.bf16.gmra.mxu1 %v5161_v24  ;;  %v5177_v29 = vsel %vm5865_vm6, %v1427_v5, %v1428_v27  ;;  %v5190_v59 = vrot.slane %v1408_v2, 1  ;;  %v1506_v10 = vsel %vm5872_vm4, %v1475_v42, %v1476_v37  ;;  %v1505_v52 = vsel %vm5873_vm10, %v1476_v37, %v1477_v3  ;;  %vm5874_vm6 = vmmov %vm5872_vm4 }
 0x1b7   : > { %v1009_v20 = vsel %vm5099_vm13, %v822_v33, 0.0  ;;  %v5186_v6 = vpack.c.bf16 %v822_v33, %v821_v14  ;;  %3592 = vmatprep.mubr.bf16.mxu1 %v5168_v4  ;;  %v1126_v53 = vand.u32 15, %v4966_v38  ;;  %v1400_v17 = vsel %vm5170_vm3, 0.0, %v4880_v21 }
 0x1b8   : > { %v1329_v5 = vsel %vm5147_vm12, 0.0, %v1009_v20  ;;  %v1490_v25 = vrot.slane %v1009_v20, 1  ;;  %v1503_v12 = vsel %vm5874_vm6, %v1478_v47, %v1479_v16  ;;  %vm5875_vm12 = vmmov %vm5872_vm4  ;;  %v1402_v38 = vsel %vm5179_vm14, 0.0, %v4941_v31  ;;  %v3935_v31 = vld [vmem:[#allocation7 + $0xb0] sm:$0xff]   ;;  %v3937_v20 = vld [vmem:[#allocation7 + $0xa0] sm:$0xff]  }
 0x1b9   : > { %v1429_v14 = vrot.slane %v1329_v5, 7  ;;  %v5876_v35 = vrot.slane %v4567_v18, 7  ;;  %vm5877_vm3 = vcmp.lt.s32.totalorder %v4535_v61, 1  ;;  %v5227_v37 = vpack.c.bf16 %v1505_v52, %v1506_v10  ;;  %vm5879_vm6 = vmmov %vm5872_vm4  ;;  %v3950_v5 = vld [vmem:[#allocation10 + $0xa8] sm:$0xff]   ;;  %v3938_v52 = vld [vmem:[#allocation7 + $0x98] sm:$0xff]  }
 0x1ba   : > { %v5207_v28 = vsel %vm5875_vm12, %v5190_v59, %v1490_v25  ;;  %v5212_v42 = vsel %vm5872_vm4, %v1490_v25, %v4598_v32  ;;  %vm5878_vm10 = vmmov %vm5877_vm3  ;;  %v1504_v41 = vsel %vm5879_vm6, %v1477_v3, %v1478_v47  ;;  %v1481_v1 = vrot.slane %v1400_v17, 1  ;;  %v3939_v17 = vld [vmem:[#allocation7 + $0x90] sm:$0xff]   ;;  %v3965_v3 = vld [vmem:[#allocation10 + $0x80] sm:$0xff]  }
 0x1bb   : > { %v1450_v21 = vsel %vm5877_vm3, %v1429_v14, %v5876_v35  ;;  %v1521_v55 = vpack.c.bf16 %v5212_v42, %v5207_v28  ;;  %v5225_v51 = vsel %vm5878_vm10, %v1428_v27, %v1429_v14  ;;  %v5234_v2 = vpack.c.bf16 %v1503_v12, %v1504_v41  ;;  %v3947_v27 = vld [vmem:[#allocation10 + $0xb0] sm:$0xff]   ;;  %vm5884_vm4 = vmpackc.low %vm4633_vm1, %vm4606_vm0 }
 0x1bc   : > { %v1451_v32 = vpack.c.bf16 %v4628_v46, %v1450_v21  ;;  %v1460_v18 = vpack.c.bf16 %v5225_v51, %v5177_v29  ;;  %v1483_v33 = vrot.slane %v1402_v38, 1  ;;  %v1480_v23 = vrot.slane %v4847_v9, 1  ;;  %v3936_v9 = vld [vmem:[#allocation7 + $0xa8] sm:$0xff]   ;;  %vm5885_vm3 = vmmov %vm5879_vm6  ;;  %v3956_v38 = vld [vmem:[#allocation10 + $0x98] sm:$0xff]  }
 0x1bd   : > { %vm5238_vm14 = vcmp.eq.s32.totalorder %v1112_v45, 0  ;;  %v1482_v46 = vrot.slane %v4906_v22, 1  ;;  %vm5245_vm12 = vcmp.eq.s32.totalorder %v1126_v53, 0  ;;  %vm5886_vm10 = vmmov %vm5885_vm3  ;;  %v1486_v10 = vrot.slane %v5038_v43, 1  ;;  %v3940_v21 = vld [vmem:[#allocation7 + $0x88] sm:$0xff]   ;;  %v3970_v29 = vld [vmem:[#allocation11 + $0x18] sm:$0xff]  }
 0x1be   : > { %3593 = vmatmul.mubr.bf16.vlgmr.msra.gmra.mxu1 %v5227_v37  ;;  %2133 = vmatmul.mubr.bf16.vlgmr.msra.gmra.mxu0 %v1451_v32  ;;  %v1404_v22 = vsel %vm5238_vm14, 0.0, %v5012_v7  ;;  %v1406_v36 = vsel %vm5245_vm12, 0.0, %v5084_v57  ;;  %vm5887_vm0 = vmmov %vm5885_vm3  ;;  %v1484_v57 = vrot.slane %v4971_v44, 1  ;;  %v1488_v35 = vrot.slane %v5120_v39, 1 }
 0x1bf   : > { %3609 = vmatpush3.bf16.msra.mxu1 %v4917_v56  ;;  %3596 = vmatprep.mubr.bf16.mxu1 %v5234_v2  ;;  %v1501_v56 = vsel %vm5885_vm3, %v1480_v23, %v1481_v1  ;;  %v1499_v45 = vsel %vm5886_vm10, %v1482_v46, %v1483_v33  ;;  %v1502_v48 = vsel %vm5887_vm0, %v1479_v16, %v1480_v23  ;;  %vm5888_vm1 = vmmov %vm5887_vm0  ;;  %v1485_v7 = vrot.slane %v1404_v22, 1  ;;  %v3953_v16 = vld [vmem:[#allocation10 + $0xa0] sm:$0xff]   ;;  %v3943_v23 = vld [vmem:[#allocation10 + $0x38] sm:$0xff]  }
 0x1c0   : > { %3237 = vmatprep.mubr.msk.bf16.mxu0 %vm5884_vm4, %v4661_v60  ;;  %3610 = vmatprep.subr.bf16.mxu1 %v3935_v31  ;;  %v5268_v60 = vpack.c.bf16 %v1501_v56, %v1502_v48  ;;  %v1487_v25 = vrot.slane %v1406_v36, 1  ;;  %vm5889_vm6 = vmmov %vm5887_vm0  ;;  %v3948_v22 = vld [vmem:[#allocation10 + $0x68] sm:$0xff]   ;;  %v3951_v36 = vld [vmem:[#allocation10 + $0x60] sm:$0xff]  }
 0x1c1   : > { %3641 = vmatpush3.bf16.msra.mxu0 %v4537_v62  ;;  %v1500_v62 = vsel %vm5888_vm1, %v1481_v1, %v1482_v46  ;;  %v1497_v53 = vsel %vm5889_vm6, %v1484_v57, %v1485_v7  ;;  %vm5890_vm14 = vmmov %vm5887_vm0  ;;  %v3959_v1 = vld [vmem:[#allocation10 + $0x90] sm:$0xff]   ;;  %v5897_v46 = vld [vmem:[#allocation34_spill] sm:$0xff] }
 0x1c2   : > { %3642 = vmatprep.subr.bf16.mxu0 %v3947_v27  ;;  %v5272_v47 = vpack.c.bf16 %v1499_v45, %v1500_v62  ;;  %vm5891_vm12 = vmmov %vm5887_vm0  ;;  %v3949_v45 = vld [vmem:[#allocation10 + $0x28] sm:$0xff]   ;;  %v5900_v48 = vld [vmem:[#allocation39_spill] sm:$0xff] }
 0x1c3   : > { %3611 = vmatpush3.bf16.msra.mxu1 %v3935_v31  ;;  %v1498_v44 = vsel %vm5891_vm12, %v1483_v33, %v1484_v57  ;;  %vm5892_vm4 = vmmov %vm5887_vm0  ;;  %v3941_v31 = vld [vmem:[#allocation7 + $0x80] sm:$0xff]   ;;  %v5895_v33 = vld [vmem:[#allocation24_spill] sm:$0xff] }
 0x1c4   : > { %3612 = vmatprep.subr.bf16.mxu1 %v3936_v9  ;;  %v5288_v43 = vpack.c.bf16 %v1497_v53, %v1498_v44  ;;  %v1496_v14 = vsel %vm5892_vm4, %v1485_v7, %v1486_v10  ;;  %vm5893_vm3 = vmmov %vm5887_vm0  ;;  %v5896_v61 = vpack.c.bf16 %v4666_v0, %v5895_v33  ;;  %v3946_v0 = vld [vmem:[#allocation10 + $0x30] sm:$0xff]   ;;  %v5902_v62 = vld [vmem:[#allocation40_spill] sm:$0xff] }
 0x1c5   : > { %3643 = vmatpush3.bf16.msra.mxu0 %v3947_v27  ;;  %v1493_v32 = vsel %vm5893_vm3, %v1488_v35, %v5190_v59  ;;  %vm5894_vm10 = vmmov %vm5887_vm0  ;;  %v3962_v59 = vld [vmem:[#allocation10 + $0x88] sm:$0xff]   ;;  %v3942_v27 = vld [vmem:[#allocation10 + $0x78] sm:$0xff]   ;;  %vm5903_vm0 = vnez %v5902_v62 }
 0x1c6   : > { %3597 = vmatmul.mubr.bf16.gmra.mxu1 %v5268_v60  ;;  %2141 = vmatmul.mubr.bf16.gmra.mxu0 %v4706_v19  ;;  %v1495_v19 = vsel %vm5890_vm14, %v1486_v10, %v1487_v25  ;;  %v1494_v41 = vsel %vm5894_vm10, %v1487_v25, %v1488_v35  ;;  %v3954_v7 = vld [vmem:[#allocation10 + $0x58] sm:$0xff]   ;;  %v3957_v25 = vld [vmem:[#allocation10 + $0x50] sm:$0xff]   ;;  %v5904_v57 = vld [vmem:[#allocation44_spill] sm:$0xff] }
 0x1c7   : > { %3613 = vmatpush3.bf16.msra.mxu1 %v3936_v9  ;;  %3600 = vmatprep.mubr.bf16.mxu1 %v5272_v47  ;;  %v5292_v12 = vpack.c.bf16 %v1495_v19, %v1496_v14  ;;  %v5306_v39 = vpack.c.bf16 %v1493_v32, %v1494_v41  ;;  %v5898_v9 = vld [vmem:[#allocation36_spill] sm:$0xff]  ;;  %v5906_v10 = vld [vmem:[#allocation45_spill] sm:$0xff]  ;;  %v3963_v44 = vld [vmem:[#allocation10 + $0x40] sm:$0xff]  }
 0x1c8   : > { %3240 = vmatprep.mubr.msk.bf16.mxu0 %vm4718_vm15, %v4730_v30  ;;  %3614 = vmatprep.subr.bf16.mxu1 %v3937_v20  ;;  %vm5907_vm1 = vnez %v5906_v10  ;;  %v3960_v53 = vld [vmem:[#allocation10 + $0x48] sm:$0xff]   ;;  %v5908_v14 = vld [vmem:[#allocation50_spill] sm:$0xff] }
 0x1c9   : > { %3644 = vmatprep.subr.bf16.mxu0 %v3950_v5  ;;  %v3961_v19 = vld [vmem:[#allocation10 + $0x8] sm:$0xff]  }
 0x1ca   : > { %3645 = vmatpush3.bf16.msra.mxu0 %v3950_v5  ;;  %v3955_v5 = vld [vmem:[#allocation10 + $0x18] sm:$0xff]  }
 0x1cb   : > { %3615 = vmatpush3.bf16.msra.mxu1 %v3937_v20  ;;  %3646 = vmatprep.subr.bf16.mxu0 %v3953_v16  ;;  %v3952_v20 = vld [vmem:[#allocation10 + $0x20] sm:$0xff]  }
 0x1cc   : > { %3616 = vmatprep.subr.bf16.mxu1 %v3938_v52 }
 0x1ce   : > { %3601 = vmatmul.mubr.bf16.gmra.mxu1 %v5288_v43  ;;  %2149 = vmatmul.mubr.bf16.gmra.mxu0 %v4766_v58 }
 0x1cf   : > { %3617 = vmatpush3.bf16.msra.mxu1 %v3938_v52  ;;  %3604 = vmatprep.mubr.bf16.mxu1 %v5292_v12  ;;  %v3958_v52 = vld [vmem:[#allocation10 + $0x10] sm:$0xff]  }
 0x1d0   : > { %3243 = vmatprep.mubr.msk.bf16.mxu0 %vm4778_vm11, %v4790_v13  ;;  %3618 = vmatprep.subr.bf16.mxu1 %v3939_v17 }
 0x1d1   : > { %3647 = vmatpush3.bf16.msra.mxu0 %v3953_v16  ;;  %v5905_v16 = vld [vmem:[#allocation46_spill] sm:$0xff] }
 0x1d2   : > { %3648 = vmatprep.subr.bf16.mxu0 %v3956_v38 }
 0x1d3   : > { %3619 = vmatpush3.bf16.msra.mxu1 %v3939_v17  ;;  %v3964_v17 = vld [vmem:[#allocation10] sm:$0xff]  }
 0x1d4   : > { %3620 = vmatprep.subr.bf16.mxu1 %v3940_v21 }
 0x1d5   : > { %3649 = vmatpush3.bf16.msra.mxu0 %v3956_v38 }
 0x1d6   : > { %3605 = vmatmul.mubr.bf16.gmra.mxu1 %v5306_v39  ;;  %2157 = vmatmul.mubr.bf16.gmra.mxu0 %v4825_v49 }
 0x1d7   : > { %3621 = vmatpush3.bf16.msra.mxu1 %v3940_v21  ;;  %3246 = vmatprep.mubr.msk.bf16.mxu0 %vm4837_vm9, %v4849_v11 }
 0x1d8   : > { %3624 = vmatprep.mubr.bf16.mxu1 %v5896_v61  ;;  %3622 = vmatprep.subr.bf16.mxu1 %v3941_v31 }
 0x1d9   : > { %3650 = vmatprep.subr.bf16.mxu0 %v3959_v1 }
 0x1da   : > { %3651 = vmatpush3.bf16.msra.mxu0 %v3959_v1 }
 0x1db   : > { %3623 = vmatpush3.bf16.msra.mxu1 %v3941_v31  ;;  %3652 = vmatprep.subr.bf16.mxu0 %v3962_v59 }
 0x1dc   : > { %3480 = vmatprep.subr.bf16.mxu1 %v3942_v27 }
 0x1de   : > { %2165 = vmatmul.mubr.bf16.gmra.mxu0 %v5897_v46  ;;  %3625 = vmatmul.mubr.bf16.vlgmr.msra.gmra.mxu1 %v5168_v4  ;;  %v5901_v4 = vld [vmem:[#allocation41_spill] sm:$0xff] }
 0x1df   : > { %3481 = vmatpush3.bf16.msra.mxu1 %v3943_v23  ;;  %3249 = vmatprep.mubr.msk.bf16.mxu0 %vm4896_vm7, %v5898_v9 }
 0x1e0   : > { %3628 = vmatprep.mubr.bf16.mxu1 %v5227_v37  ;;  %3482 = vmatprep.subr.bf16.mxu1 %v3945_v54 }
 0x1e1   : > { %3653 = vmatpush3.bf16.msra.mxu0 %v3962_v59 }
 0x1e2   : > { %3654 = vmatprep.subr.bf16.mxu0 %v3965_v3 }
 0x1e3   : > { %3483 = vmatpush3.bf16.msra.mxu1 %v3946_v0 }
 0x1e4   : > { %3484 = vmatprep.subr.bf16.mxu1 %v3948_v22 }
 0x1e5   : > { %3655 = vmatpush3.bf16.msra.mxu0 %v3965_v3 }
 0x1e6   : > { %2173 = vmatmul.mubr.bf16.gmra.mxu0 %v5900_v48  ;;  %3629 = vmatmul.mubr.bf16.gmra.mxu1 %v5234_v2 }
 0x1e7   : > { %3485 = vmatpush3.bf16.msra.mxu1 %v3949_v45  ;;  %3252 = vmatprep.mubr.msk.bf16.mxu0 %vm5903_vm0, %v5901_v4 }
 0x1e8   : > { %3632 = vmatprep.mubr.bf16.mxu1 %v5268_v60  ;;  %3486 = vmatprep.subr.bf16.mxu1 %v3951_v36 }
 0x1eb   : > { %3487 = vmatpush3.bf16.msra.mxu1 %v3952_v20 }
 0x1ec   : > { %3488 = vmatprep.subr.bf16.mxu1 %v3954_v7 }
 0x1ee   : > { %2181 = vmatmul.mubr.bf16.gmra.mxu0 %v5904_v57  ;;  %3633 = vmatmul.mubr.bf16.gmra.mxu1 %v5272_v47 }
 0x1ef   : > { %3489 = vmatpush3.bf16.msra.mxu1 %v3955_v5  ;;  %3255 = vmatprep.mubr.msk.bf16.mxu0 %vm5907_vm1, %v5905_v16 }
 0x1f0   : > { %3636 = vmatprep.mubr.bf16.mxu1 %v5288_v43  ;;  %3490 = vmatprep.subr.bf16.mxu1 %v3957_v25 }
 0x1f3   : > { %3491 = vmatpush3.bf16.msra.mxu1 %v3958_v52 }
 0x1f4   : > { %3492 = vmatprep.subr.bf16.mxu1 %v3960_v53 }
 0x1f6   : > { %2189 = vmatmul.mubr.bf16.gmra.mxu0 %v5908_v14  ;;  %3637 = vmatmul.mubr.bf16.gmra.mxu1 %v5292_v12 }
 0x1f7   : > { %3493 = vmatpush3.bf16.msra.mxu1 %v3961_v19  ;;  %3282 = vmatprep.mubr.msk.bf16.mxu1 %vm4718_vm15, %v4730_v30  ;;  %vm5909_vm15 = vmpackc.low %vm5054_vm5, %vm5061_vm2  ;;  %v3966_v30 = vld [vmem:[#allocation11 + $0x38] sm:$0xff]  }
 0x1f8   : > { %3656 = vmatprep.mubr.bf16.mxu0 %v5227_v37  ;;  %3494 = vmatprep.subr.bf16.mxu1 %v3963_v44 }
 0x1f9   : > { %3672 = vmatprep.subr.bf16.mxu0 %v3966_v30 }
 0x1fb   : > { %3495 = vmatpush3.bf16.msra.mxu1 %v3964_v17 }
 0x1fc   : > { %3704 = vmatprep.subr.bf16.mxu1 %v3966_v30 }
 0x1fe   : > { %2519 = vmatmul.mubr.bf16.vlgmr.msra.gmra.mxu1 %v4766_v58  ;;  %3657 = vmatmul.mubr.bf16.vlgmr.msra.gmra.mxu0 %v5234_v2  ;;  %v3967_v58 = vld [vmem:[#allocation11 + $0x30] sm:$0xff]   ;;  %v3972_v2 = vld [vmem:[#allocation11 + $0x8] sm:$0xff]  }
 0x1ff   : > { %3285 = vmatprep.mubr.msk.bf16.mxu1 %vm4778_vm11, %v4790_v13  ;;  %3660 = vmatprep.mubr.bf16.mxu0 %v5268_v60  ;;  %vm5911_vm11 = vmpackc.low %vm5099_vm13, %vm5088_vm8 }
 0x200   : > { %3673 = vmatpush3.bf16.msra.mxu0 %v3966_v30  ;;  %3712 = vmatpush3.bf16.msra.mxu1 %v3966_v30 }
 0x201   : > { %3674 = vmatprep.subr.bf16.mxu0 %v3967_v58  ;;  %3705 = vmatprep.subr.bf16.mxu1 %v3967_v58 }
 0x204   : > { %3675 = vmatpush3.bf16.msra.mxu0 %v3967_v58  ;;  %3713 = vmatpush3.bf16.msra.mxu1 %v3967_v58 }
 0x206   : > { %2527 = vmatmul.mubr.bf16.gmra.mxu1 %v4825_v49  ;;  %3661 = vmatmul.mubr.bf16.gmra.mxu0 %v5272_v47  ;;  %v3968_v49 = vld [vmem:[#allocation11 + $0x28] sm:$0xff]  }
 0x207   : > { %3288 = vmatprep.mubr.msk.bf16.mxu1 %vm4837_vm9, %v4849_v11  ;;  %3664 = vmatprep.mubr.bf16.mxu0 %v5288_v43 }
 0x208   : > { %3676 = vmatprep.subr.bf16.mxu0 %v3968_v49  ;;  %3706 = vmatprep.subr.bf16.mxu1 %v3968_v49 }
 0x209   : > { %3677 = vmatpush3.bf16.msra.mxu0 %v3968_v49  ;;  %3714 = vmatpush3.bf16.msra.mxu1 %v3968_v49 }
 0x20a   : > { %3678 = vmatprep.subr.bf16.mxu0 %v3969_v50  ;;  %3707 = vmatprep.subr.bf16.mxu1 %v3969_v50 }
 0x20d   : > { %3679 = vmatpush3.bf16.msra.mxu0 %v3969_v50  ;;  %3715 = vmatpush3.bf16.msra.mxu1 %v3969_v50 }
 0x20e   : > { %2535 = vmatmul.mubr.bf16.gmra.mxu1 %v5897_v46  ;;  %3665 = vmatmul.mubr.bf16.gmra.mxu0 %v5292_v12  ;;  %v3973_v12 = vld [vmem:[#allocation11] sm:$0xff]  }
 0x20f   : > { %3291 = vmatprep.mubr.msk.bf16.mxu1 %vm4896_vm7, %v5898_v9  ;;  %3668 = vmatprep.mubr.bf16.mxu0 %v5306_v39 }
 0x210   : > { %3680 = vmatprep.subr.bf16.mxu0 %v3970_v29  ;;  %3708 = vmatprep.subr.bf16.mxu1 %v3970_v29 }
 0x211   : > { %3681 = vmatpush3.bf16.msra.mxu0 %v3970_v29  ;;  %3716 = vmatpush3.bf16.msra.mxu1 %v3970_v29 }
 0x216   : > { %2543 = vmatmul.mubr.bf16.gmra.mxu1 %v5900_v48  ;;  %3669 = vmatmul.mubr.bf16.gmra.mxu0 %v1521_v55  ;;  %v3971_v55 = vld [vmem:[#allocation11 + $0x10] sm:$0xff]  }
 0x217   : > { %3294 = vmatprep.mubr.msk.bf16.mxu1 %vm5903_vm0, %v5901_v4  ;;  %3682 = vmatprep.subr.bf16.mxu0 %v3971_v55 }
 0x218   : > { %3709 = vmatprep.subr.bf16.mxu1 %v3971_v55  ;;  %3683 = vmatpush3.bf16.msra.mxu0 %v3971_v55 }
 0x219   : > { %3717 = vmatpush3.bf16.msra.mxu1 %v3971_v55  ;;  %3684 = vmatprep.subr.bf16.mxu0 %v3972_v2 }
 0x21a   : > { %3710 = vmatprep.subr.bf16.mxu1 %v3972_v2 }
 0x21c   : > { %3685 = vmatpush3.bf16.msra.mxu0 %v3972_v2 }
 0x21d   : > { %3718 = vmatpush3.bf16.msra.mxu1 %v3972_v2  ;;  %3686 = vmatprep.subr.bf16.mxu0 %v3973_v12 }
 0x21e   : > { %2551 = vmatmul.mubr.bf16.gmra.mxu1 %v5904_v57  ;;  %3711 = vmatprep.subr.bf16.mxu1 %v3973_v12 }
 0x21f   : > { %3297 = vmatprep.mubr.msk.bf16.mxu1 %vm5907_vm1, %v5905_v16 }
 0x220   : > { %3687 = vmatpush3.bf16.msra.mxu0 %v3973_v12 }
 0x221   : > { %3719 = vmatpush3.bf16.msra.mxu1 %v3973_v12 }
 0x226   : > { %2559 = vmatmul.mubr.bf16.gmra.mxu1 %v5908_v14 }
 0x227   : > { %3300 = vmatprep.mubr.msk.bf16.mxu1 %vm5909_vm15, %v5122_v34 }
 0x22e   : > { %2567 = vmatmul.mubr.bf16.gmra.mxu1 %v5161_v24 }
 0x22f   : > { %3303 = vmatprep.mubr.msk.bf16.mxu1 %vm5911_vm11, %v5186_v6 }
 0x236   : > { %2575 = vmatmul.mubr.bf16.gmra.mxu1 %v1460_v18 }
 0x23e   : > { %v3336_v8 = vpop.f32.mrf.mxu1 }
 0x240   : > { %v3337_v13 = vpop.f32.mrf.mxu1 }
 0x241   : > { %v5386_v40 = vadd.f32 %v3337_v13, %v3336_v8 }
 0x242   : > { %v3339_v11 = vpop.f32.mrf.mxu1 }
 0x244   : > { %v3340_v63 = vpop.f32.mrf.mxu1 }
 0x245   : > { %v5388_v15 = vadd.f32 %v3340_v63, %v3339_v11 }
 0x246   : > { %v3342_v34 = vpop.f32.mrf.mxu1 }
 0x248   : > { %v3343_v24 = vpop.f32.mrf.mxu1 }
 0x249   : > { %v3344_v6 = vadd.f32 %v3343_v24, %v3342_v34 }
 0x24a   : > { %v3345_v28 = vpop.f32.mrf.mxu1 }
 0x24c   : > { %v3346_v42 = vpop.f32.mrf.mxu1 }
 0x24d   : > { %v3347_v51 = vadd.f32 %v3346_v42, %v3345_v28 }
 0x24e   : > { %v3348_v37 = vpop.f32.mrf.mxu1 }
 0x250   : > { %v3349_v18 = vpop.f32.mrf.mxu1 }
 0x251   : > { %v3350_v60 = vadd.f32 %v3349_v18, %v3348_v37 }
 0x252   : > { %v3351_v47 = vpop.f32.mrf.mxu1 }
 0x254   : > { %v3352_v43 = vpop.f32.mrf.mxu1 }
 0x255   : > { %v3353_v38 = vadd.f32 %v3352_v43, %v3351_v47 }
 0x256   : > { %v3354_v35 = vpop.f32.mrf.mxu1 }
 0x258   : > { %v3355_v21 = vpop.f32.mrf.mxu1 }
 0x259   : > { %v3356_v32 = vadd.f32 %v3355_v21, %v3354_v35 }
 0x25a   : > { %v3357_v41 = vpop.f32.mrf.mxu1 }
 0x25c   : > { %v3358_v39 = vpop.f32.mrf.mxu1 }
 0x25d   : > { %v3359_v31 = vadd.f32 %v3358_v39, %v3357_v41 }
 0x25e   : > { %v3360_v1 = vpop.f32.mrf.mxu1 }
 0x260   : > { %v3361_v59 = vpop.f32.mrf.mxu1 }
 0x261   : > { %v3362_v33 = vadd.f32 %v3361_v59, %v3360_v1 }
 0x262   : > { %v3363_v61 = vpop.f32.mrf.mxu1 }
 0x264   : > { %v3364_v27 = vpop.f32.mrf.mxu1 }
 0x265   : > { %v3365_v23 = vadd.f32 %v3364_v27, %v3363_v61 }
 0x266   : > { %v3366_v54 = vpop.f32.mrf.mxu1 }
 0x268   : > { %v3367_v46 = vpop.f32.mrf.mxu1 }
 0x269   : > { %v3368_v3 = vadd.f32 %v3367_v46, %v3366_v54 }
 0x26a   : > { %v3369_v9 = vpop.f32.mrf.mxu1 }
 0x26c   : > { %v3370_v56 = vpop.f32.mrf.mxu1 }
 0x26d   : > { %v3371_v0 = vadd.f32 %v3370_v56, %v3369_v9 }
 0x26e   : > { %v3372_v22 = vpop.f32.mrf.mxu1 }
 0x270   : > { %v3373_v45 = vpop.f32.mrf.mxu1 }
 0x271   : > { %v3374_v36 = vadd.f32 %v3373_v45, %v3372_v22 }
 0x272   : > { %v3375_v48 = vpop.f32.mrf.mxu1 }
 0x274   : > { %v3376_v4 = vpop.f32.mrf.mxu1 }
 0x275   : > { %v3377_v62 = vadd.f32 %v3376_v4, %v3375_v48 }
 0x276   : > { %v3378_v20 = vpop.f32.mrf.mxu1 }
 0x278   : > { %v3379_v7 = vpop.f32.mrf.mxu1 }
 0x279   : > { %v3380_v5 = vadd.f32 %v3379_v7, %v3378_v20 }
 0x27a   : > { %v3381_v25 = vpop.f32.mrf.mxu1 }
 0x27c   : > { %v3382_v57 = vpop.f32.mrf.mxu1 }
 0x27d   : > { %v3383_v16 = vadd.f32 %v3382_v57, %v3381_v25 }
 0x27e   : > { %v3594_v10 = vpop.f32.mrf.mxu1  ;;  %v3416_v52 = vpop.f32.mrf.mxu0 }
 0x27f   : > { %v1902_v53 = vadd.f32 %v3594_v10, %v3344_v6 }
 0x280   : > { %v1893_v19 = vpop.f32.mrf.mxu1  ;;  %v3417_v44 = vpop.f32.mrf.mxu0 }
 0x281   : > { %v1894_v14 = vadd.f32 %v5386_v40, %v1893_v19  ;;  %v3418_v17 = vadd.f32 %v3417_v44, %v3416_v52 }
 0x282   : > { %v3595_v26 = vpop.f32.mrf.mxu1  ;;  %v5391_v30 = vpop.f32.mrf.mxu0 }
 0x283   : > { %v5393_v58 = vadd.f32 %v3595_v26, %v3347_v51  ;;  %v5395_v8 = vadd.f32 %v3418_v17, %v1894_v14 }
 0x284   : > { %v5397_v13 = vpop.f32.mrf.mxu1  ;;  %v5399_v49 = vpop.f32.mrf.mxu0 }
 0x286   : > { %v3598_v11 = vpop.f32.mrf.mxu1  ;;  %v3422_v63 = vpop.f32.mrf.mxu0 }
 0x287   : > { %v1918_v50 = vadd.f32 %v3598_v11, %v3356_v32 }
 0x288   : > { %v1909_v34 = vpop.f32.mrf.mxu1  ;;  %v3423_v24 = vpop.f32.mrf.mxu0 }
 0x289   : > { %v1910_v29 = vadd.f32 %v3350_v60, %v1909_v34  ;;  %v3424_v6 = vadd.f32 %v3423_v24, %v3422_v63 }
 0x28a   : > { %v3599_v40 = vpop.f32.mrf.mxu1  ;;  %v5401_v28 = vpop.f32.mrf.mxu0 }
 0x28b   : > { %v5403_v42 = vadd.f32 %v3599_v40, %v3359_v31  ;;  %v5405_v55 = vadd.f32 %v3424_v6, %v1902_v53 }
 0x28c   : > { %v1912_v51 = vpop.f32.mrf.mxu1  ;;  %v5407_v37 = vpop.f32.mrf.mxu0 }
 0x28d   : > { %v5409_v18 = vadd.f32 %v3353_v38, %v1912_v51 }
 0x28e   : > { %v3602_v2 = vpop.f32.mrf.mxu1  ;;  %v3428_v47 = vpop.f32.mrf.mxu0 }
 0x28f   : > { %v1934_v43 = vadd.f32 %v3602_v2, %v3368_v3 }
 0x290   : > { %v1925_v12 = vpop.f32.mrf.mxu1  ;;  %v3429_v35 = vpop.f32.mrf.mxu0 }
 0x291   : > { %v1926_v21 = vadd.f32 %v3362_v33, %v1925_v12  ;;  %v3430_v60 = vadd.f32 %v3429_v35, %v3428_v47 }
 0x292   : > { %v3603_v32 = vpop.f32.mrf.mxu1  ;;  %v5411_v41 = vpop.f32.mrf.mxu0 }
 0x293   : > { %v5413_v39 = vadd.f32 %v3603_v32, %v3371_v0  ;;  %v5415_v31 = vadd.f32 %v3430_v60, %v1910_v29 }
 0x294   : > { %v1928_v1 = vpop.f32.mrf.mxu1  ;;  %v5417_v59 = vpop.f32.mrf.mxu0 }
 0x295   : > { %v5419_v61 = vadd.f32 %v3365_v23, %v1928_v1 }
 0x296   : > { %v3606_v38 = vpop.f32.mrf.mxu1  ;;  %v3434_v27 = vpop.f32.mrf.mxu0 }
 0x297   : > { %v1950_v54 = vadd.f32 %v3606_v38, %v3380_v5 }
 0x298   : > { %v1941_v46 = vpop.f32.mrf.mxu1  ;;  %v3435_v3 = vpop.f32.mrf.mxu0 }
 0x299   : > { %v1942_v9 = vadd.f32 %v3374_v36, %v1941_v46  ;;  %v3436_v33 = vadd.f32 %v3435_v3, %v3434_v27 }
 0x29a   : > { %v3607_v56 = vpop.f32.mrf.mxu1  ;;  %v5421_v22 = vpop.f32.mrf.mxu0 }
 0x29b   : > { %v1953_v45 = vadd.f32 %v3607_v56, %v3383_v16  ;;  %v5423_v0 = vadd.f32 %v3436_v33, %v1918_v50 }
 0x29c   : > { %v1944_v48 = vpop.f32.mrf.mxu1  ;;  %v5425_v4 = vpop.f32.mrf.mxu0 }
 0x29d   : > { %v5427_v20 = vadd.f32 %v3377_v62, %v1944_v48 }
 0x29e   : > { %v3440_v23 = vpop.f32.mrf.mxu0  ;;  %v5429_v7 = vpop.f32.mrf.mxu1 }
 0x2a0   : > { %v3441_v25 = vpop.f32.mrf.mxu0  ;;  %v2231_v5 = vpop.f32.mrf.mxu1 }
 0x2a1   : > { %v3442_v57 = vadd.f32 %v3441_v25, %v3440_v23 }
 0x2a2   : > { %v5431_v10 = vpop.f32.mrf.mxu0  ;;  %v5433_v36 = vpop.f32.mrf.mxu1 }
 0x2a3   : > { %v5435_v52 = vadd.f32 %v3442_v57, %v1926_v21 }
 0x2a4   : > { %v5437_v16 = vpop.f32.mrf.mxu0  ;;  %v2234_v53 = vpop.f32.mrf.mxu1 }
 0x2a6   : > { %v3446_v19 = vpop.f32.mrf.mxu0  ;;  %v5439_v44 = vpop.f32.mrf.mxu1 }
 0x2a8   : > { %v3447_v62 = vpop.f32.mrf.mxu0  ;;  %v5441_v14 = vpop.f32.mrf.mxu1 }
 0x2a9   : > { %v3448_v17 = vadd.f32 %v3447_v62, %v3446_v19 }
 0x2aa   : > { %v5443_v26 = vpop.f32.mrf.mxu0  ;;  %v5445_v11 = vpop.f32.mrf.mxu1 }
 0x2ab   : > { %v2175_v63 = vadd.f32 %v3448_v17, %v1934_v43 }
 0x2ac   : > { %v5447_v50 = vpop.f32.mrf.mxu0  ;;  %v5449_v34 = vpop.f32.mrf.mxu1 }
 0x2ae   : > { %v3452_v24 = vpop.f32.mrf.mxu0  ;;  %v3634_v29 = vpop.f32.mrf.mxu1 }
 0x2af   : > { %v5451_v6 = vadd.f32 %v3634_v29, %v2175_v63  ;;  %v1897_v63 = vadd.f32 %v5388_v15, %v5397_v13 }
 0x2b0   : > { %v3453_v40 = vpop.f32.mrf.mxu0  ;;  %v5453_v51 = vpop.f32.mrf.mxu1 }
 0x2b1   : > { %v3454_v2 = vadd.f32 %v3453_v40, %v3452_v24  ;;  %v3421_v24 = vadd.f32 %v5399_v49, %v5391_v30 }
 0x2b2   : > { %v5455_v47 = vpop.f32.mrf.mxu0  ;;  %v5457_v12 = vpop.f32.mrf.mxu1 }
 0x2b3   : > { %v5459_v35 = vadd.f32 %v3454_v2, %v1942_v9 }
 0x2b4   : > { %v5461_v21 = vpop.f32.mrf.mxu0  ;;  %v5463_v43 = vpop.f32.mrf.mxu1 }
 0x2b6   : > { %v3458_v60 = vpop.f32.mrf.mxu0  ;;  %v3638_v32 = vpop.f32.mrf.mxu1 }
 0x2b8   : > { %v3459_v1 = vpop.f32.mrf.mxu0  ;;  %v5465_v38 = vpop.f32.mrf.mxu1 }
 0x2b9   : > { %v3460_v27 = vadd.f32 %v3459_v1, %v3458_v60  ;;  %v2232_v60 = vadd.f32 %v2231_v5, %v5395_v8 }
 0x2ba   : > { %v3461_v46 = vpop.f32.mrf.mxu0  ;;  %v3639_v3 = vpop.f32.mrf.mxu1 }
 0x2bb   : > { %v2191_v33 = vadd.f32 %v3460_v27, %v1950_v54  ;;  %v2138_v27 = vadd.f32 %v3421_v24, %v1897_v63 }
 0x2bc   : > { %v3462_v56 = vpop.f32.mrf.mxu0  ;;  %v5467_v48 = vpop.f32.mrf.mxu1 }
 0x2bd   : > { %v5469_v23 = vadd.f32 %v3638_v32, %v2191_v33  ;;  %v3463_v9 = vadd.f32 %v3462_v56, %v3461_v46  ;;  %v5481_v33 = vld [vmem:[%s5681_s7] ss:$0 sm:$0xff]  ;;  %v2235_v30 = vadd.f32 %v2234_v53, %v2138_v27 }
 0x2be   : > { %v3496_v25 = vpop.f32.mrf.mxu1  ;;  %v3658_v57 = vpop.f32.mrf.mxu0 }
 0x2bf   : > { %v2194_v19 = vadd.f32 %v3463_v9, %v1953_v45 }
 0x2c0   : > { %v3497_v62 = vpop.f32.mrf.mxu1  ;;  %v2617_v17 = vpop.f32.mrf.mxu0 }
 0x2c1   : > { %v5475_v29 = vadd.f32 %v3639_v3, %v2194_v19  ;;  %v3498_v54 = vadd.f32 %v3497_v62, %v3496_v25  ;;  %v3427_v3 = vadd.f32 %v5407_v37, %v5401_v28  ;;  %v2240_v62 = vadd.f32 %v5429_v7, %v5405_v55 }
 0x2c2   : > { %v3499_v40 = vpop.f32.mrf.mxu1  ;;  %v3659_v2 = vpop.f32.mrf.mxu0 }
 0x2c3   : > { %v2618_v32 = vadd.f32 %v3498_v54, %v2617_v17  ;;  %v2146_v24 = vadd.f32 %v3427_v3, %v5393_v58 }
 0x2c4   : > { %v3500_v1 = vpop.f32.mrf.mxu1  ;;  %v2620_v15 = vpop.f32.mrf.mxu0 }
 0x2c5   : > { %v2680_v46 = vadd.f32 %v2618_v32, %v2232_v60  ;;  %v3501_v45 = vadd.f32 %v3500_v1, %v3499_v40  ;;  %v2243_v1 = vadd.f32 %v5433_v36, %v2146_v24 }
 0x2c6   : > { %v3502_v13 = vpop.f32.mrf.mxu1  ;;  %v3662_v25 = vpop.f32.mrf.mxu0 }
 0x2c7   : > { %v2621_v49 = vadd.f32 %v3501_v45, %v2620_v15  ;;  %v2703_v8 = vadd.f32 %v5481_v33, %v2680_v46  ;;  %v3433_v45 = vadd.f32 %v5417_v59, %v5411_v41 }
 0x2c8   : > { %v3503_v56 = vpop.f32.mrf.mxu1  ;;  %v2633_v37 = vpop.f32.mrf.mxu0 }
 0x2c9   : > { %v2681_v5 = vadd.f32 %v2621_v49, %v2235_v30  ;;  %v3504_v9 = vadd.f32 %v3503_v56, %v3502_v13  ;;  %v2719_v54 = vmax.f32 %v2703_v8, 0.0  ;;  %v2248_v30 = vadd.f32 %v5441_v14, %v5415_v31 }
 0x2ca   : > { %v3505_v19 = vpop.f32.mrf.mxu1  ;;  %v3663_v58 = vpop.f32.mrf.mxu0  ;;  %v2154_v36 = vadd.f32 %v3433_v45, %v5409_v18 }
 0x2cb   : > { %v2704_v17 = vadd.f32 %v5481_v33, %v2681_v5  ;;  %v2626_v63 = vadd.f32 %v3658_v57, %v3504_v9 }
 0x2cc   : > { %v3506_v53 = vpop.f32.mrf.mxu1  ;;  %v2636_v5 = vpop.f32.mrf.mxu0 }
 0x2cd   : > { %v2720_v40 = vmax.f32 %v2704_v17, 0.0  ;;  %v2682_v60 = vadd.f32 %v2626_v63, %v2240_v62  ;;  %v3507_v28 = vadd.f32 %v3506_v53, %v3505_v19  ;;  %v2251_v19 = vadd.f32 %v5449_v34, %v2154_v36 }
 0x2ce   : > { %v3508_v32 = vpop.f32.mrf.mxu1  ;;  %v3439_v63 = vadd.f32 %v5425_v4, %v5421_v22  ;;  %v3666_v53 = vpop.f32.mrf.mxu0 }
 0x2cf   : > { %v2629_v27 = vadd.f32 %v3659_v2, %v3507_v28  ;;  %v2735_v46 = vpack.c.bf16 %v2720_v40, %v2719_v54  ;;  %v2705_v7 = vadd.f32 %v5481_v33, %v2682_v60  ;;  %v2256_v40 = vadd.f32 %v5439_v44, %v5423_v0 }
 0x2d0   : > { %v3509_v55 = vpop.f32.mrf.mxu1  ;;  %v2162_v34 = vadd.f32 %v3439_v63, %v5403_v42 }
 0x2d1   : > { %v2683_v57 = vadd.f32 %v2629_v27, %v2243_v1  ;;  %v3510_v15 = vadd.f32 %v3509_v55, %v3508_v32  ;;  %3688 = vmatprep.mubr.bf16.mxu0 %v2735_v46  ;;  %v2721_v56 = vmax.f32 %v2705_v7, 0.0  ;;  %v2649_v27 = vpop.f32.mrf.mxu0 }
 0x2d2   : > { %v3511_v13 = vpop.f32.mrf.mxu1  ;;  %v2259_v45 = vadd.f32 %v5445_v11, %v2162_v34 }
 0x2d3   : > { %v2706_v49 = vadd.f32 %v5481_v33, %v2683_v57  ;;  %v2634_v3 = vadd.f32 %v3510_v15, %v2633_v37  ;;  %v3445_v57 = vadd.f32 %v5437_v16, %v5431_v10  ;;  %v3667_v15 = vpop.f32.mrf.mxu0 }
 0x2d4   : > { %v3512_v2 = vpop.f32.mrf.mxu1 }
 0x2d5   : > { %v2722_v8 = vmax.f32 %v2706_v49, 0.0  ;;  %v2684_v41 = vadd.f32 %v2634_v3, %v2248_v30  ;;  %v3513_v59 = vadd.f32 %v3512_v2, %v3511_v13  ;;  %v2264_v30 = vadd.f32 %v5453_v51, %v5435_v52 }
 0x2d6   : > { %v3514_v9 = vpop.f32.mrf.mxu1  ;;  %v2170_v11 = vadd.f32 %v3445_v57, %v5419_v61 }
 0x2d7   : > { %v2736_v62 = vpack.c.bf16 %v2722_v8, %v2721_v56  ;;  %v2637_v17 = vadd.f32 %v3513_v59, %v2636_v5  ;;  %v2707_v18 = vadd.f32 %v5481_v33, %v2684_v41  ;;  %v2652_v56 = vpop.f32.mrf.mxu0 }
 0x2d8   : > { %v3515_v31 = vpop.f32.mrf.mxu1  ;;  %v2267_v41 = vadd.f32 %v5463_v43, %v2170_v11 }
 0x2d9   : > { %v2685_v14 = vadd.f32 %v2637_v17, %v2251_v19  ;;  %v3516_v24 = vadd.f32 %v3515_v31, %v3514_v9  ;;  %3689 = vmatmul.mubr.bf16.vlgmr.msra.gmra.mxu0 %v2736_v62  ;;  %v2723_v22 = vmax.f32 %v2707_v18, 0.0  ;;  %v3451_v9 = vadd.f32 %v5447_v50, %v5443_v26  ;;  %v3670_v62 = vpop.f32.mrf.mxu0 }
 0x2da   : > { %v3517_v54 = vpop.f32.mrf.mxu1 }
 0x2db   : > { %v2642_v60 = vadd.f32 %v3662_v25, %v3516_v24  ;;  %v2708_v28 = vadd.f32 %v5481_v33, %v2685_v14  ;;  %v2178_v14 = vadd.f32 %v3451_v9, %v5413_v39  ;;  %v2665_v26 = vpop.f32.mrf.mxu0  ;;  %v5544_v9 = vld [vmem:[%s5912_s4] ss:$0 sm:$0xff] }
 0x2dc   : > { %v3518_v37 = vpop.f32.mrf.mxu1 }
 0x2dd   : > { %v2686_v32 = vadd.f32 %v2642_v60, %v2256_v40  ;;  %v3519_v1 = vadd.f32 %v3518_v37, %v3517_v54  ;;  %v2724_v4 = vmax.f32 %v2708_v28, 0.0  ;;  %v2275_v60 = vadd.f32 %v5457_v12, %v2178_v14  ;;  %v5915_v14 = vld [vmem:[#allocation27_spill] sm:$0xff] }
 0x2de   : > { %v3520_v46 = vpop.f32.mrf.mxu1  ;;  %v3457_v37 = vadd.f32 %v5461_v21, %v5455_v47 }
 0x2df   : > { %v2645_v55 = vadd.f32 %v3663_v58, %v3519_v1  ;;  %v2737_v7 = vpack.c.bf16 %v2724_v4, %v2723_v22  ;;  %v2709_v42 = vadd.f32 %v5481_v33, %v2686_v32  ;;  %v3671_v22 = vpop.f32.mrf.mxu0  ;;  %v2280_v4 = vadd.f32 %v5465_v38, %v5459_v35 }
 0x2e0   : > { %v3521_v0 = vpop.f32.mrf.mxu1  ;;  %v2186_v12 = vadd.f32 %v3457_v37, %v5427_v20 }
 0x2e1   : > { %v2687_v44 = vadd.f32 %v2645_v55, %v2259_v45  ;;  %v3522_v25 = vadd.f32 %v3521_v0, %v3520_v46  ;;  %3692 = vmatprep.mubr.bf16.mxu0 %v2737_v7  ;;  %v2725_v10 = vmax.f32 %v2709_v42, 0.0  ;;  %v2668_v57 = vpop.f32.mrf.mxu0 }
 0x2e2   : > { %v3523_v13 = vpop.f32.mrf.mxu1 }
 0x2e3   : > { %v2650_v49 = vadd.f32 %v3522_v25, %v2649_v27  ;;  %v2710_v3 = vadd.f32 %v5481_v33, %v2687_v44  ;;  %v2283_v44 = vadd.f32 %v5467_v48, %v2186_v12 }
 0x2e4   : > { %v3524_v58 = vpop.f32.mrf.mxu1 }
 0x2e5   : > { %v2688_v36 = vadd.f32 %v2650_v49, %v2264_v30  ;;  %v3525_v2 = vadd.f32 %v3524_v58, %v3523_v13  ;;  %v2726_v16 = vmax.f32 %v2710_v3, 0.0 }
 0x2e6   : > { %v3526_v8 = vpop.f32.mrf.mxu1 }
 0x2e7   : > { %v2653_v59 = vadd.f32 %v3525_v2, %v2652_v56  ;;  %v2738_v5 = vpack.c.bf16 %v2726_v16, %v2725_v10  ;;  %v2711_v61 = vadd.f32 %v5481_v33, %v2688_v36 }
 0x2e8   : > { %v3527_v52 = vpop.f32.mrf.mxu1 }
 0x2e9   : > { %v2689_v51 = vadd.f32 %v2653_v59, %v2267_v41  ;;  %v3528_v19 = vadd.f32 %v3527_v52, %v3526_v8  ;;  %3693 = vmatmul.mubr.bf16.gmra.mxu0 %v2738_v5  ;;  %v2727_v54 = vmax.f32 %v2711_v61, 0.0  ;;  %v5914_v61 = vld [vmem:[#allocation23_spill] sm:$0xff] }
 0x2ea   : > { %v3529_v17 = vpop.f32.mrf.mxu1 }
 0x2eb   : > { %v2658_v63 = vadd.f32 %v3666_v53, %v3528_v19  ;;  %v2712_v31 = vadd.f32 %v5481_v33, %v2689_v51  ;;  %v5913_v51 = vld [vmem:[#allocation26_spill] sm:$0xff] }
 0x2ec   : > { %v3530_v24 = vpop.f32.mrf.mxu1 }
 0x2ed   : > { %v2690_v43 = vadd.f32 %v2658_v63, %v5451_v6  ;;  %v3531_v18 = vadd.f32 %v3530_v24, %v3529_v17  ;;  %v2728_v40 = vmax.f32 %v2712_v31, 0.0  ;;  %v833_v24 = vadd.f32 %v5544_v9, %v5915_v14 }
 0x2ee   : > { %v3532_v50 = vpop.f32.mrf.mxu1 }
 0x2ef   : > { %v2661_v28 = vadd.f32 %v3667_v15, %v3531_v18  ;;  %v2739_v34 = vpack.c.bf16 %v2728_v40, %v2727_v54  ;;  %v2713_v39 = vadd.f32 %v5481_v33, %v2690_v43 }
 0x2f0   : > { %v3533_v53 = vpop.f32.mrf.mxu1 }
 0x2f1   : > { %v2691_v32 = vadd.f32 %v2661_v28, %v2275_v60  ;;  %v3534_v1 = vadd.f32 %v3533_v53, %v3532_v50  ;;  %3696 = vmatprep.mubr.bf16.mxu0 %v2739_v34  ;;  %v2729_v47 = vmax.f32 %v2713_v39, 0.0  ;;  %v5917_v39 = vld [vmem:[#allocation30_spill] sm:$0xff] }
 0x2f2   : > { %v3535_v6 = vpop.f32.mrf.mxu1 }
 0x2f3   : > { %v2666_v27 = vadd.f32 %v3534_v1, %v2665_v26  ;;  %v2714_v46 = vadd.f32 %v5481_v33, %v2691_v32  ;;  %v5916_v26 = vld [vmem:[#allocation25_spill] sm:$0xff] }
 0x2f4   : > { %v3536_v45 = vpop.f32.mrf.mxu1  ;;  %v831_v50 = vadd.f32 %v5544_v9, %v5916_v26 }
 0x2f5   : > { %v2692_v55 = vadd.f32 %v2666_v27, %v2280_v4  ;;  %v3537_v7 = vadd.f32 %v3536_v45, %v3535_v6  ;;  %v2730_v21 = vmax.f32 %v2714_v46, 0.0  ;;  %v5918_v27 = vld [vmem:[#allocation28_spill] sm:$0xff] }
 0x2f6   : > { %v3538_v0 = vpop.f32.mrf.mxu1  ;;  %v834_v46 = vadd.f32 %v5544_v9, %v5918_v27 }
 0x2f7   : > { %v2669_v25 = vadd.f32 %v3537_v7, %v2668_v57  ;;  %v2740_v42 = vpack.c.bf16 %v2730_v21, %v2729_v47  ;;  %v2715_v35 = vadd.f32 %v5481_v33, %v2692_v55  ;;  %v5919_v7 = vld [vmem:[#allocation31_spill] sm:$0xff] }
 0x2f8   : > { %v3539_v15 = vpop.f32.mrf.mxu1  ;;  %v837_v47 = vadd.f32 %v5544_v9, %v5919_v7 }
 0x2f9   : > { %v2693_v13 = vadd.f32 %v2669_v25, %v2283_v44  ;;  %v3540_v30 = vadd.f32 %v3539_v15, %v3538_v0  ;;  %3697 = vmatmul.mubr.bf16.gmra.mxu0 %v2740_v42  ;;  %v2731_v36 = vmax.f32 %v2715_v35, 0.0  ;;  %v5920_v25 = vld [vmem:[#allocation29_spill] sm:$0xff] }
 0x2fa   : > { %v3541_v38 = vpop.f32.mrf.mxu1  ;;  %v835_v42 = vadd.f32 %v5544_v9, %v5920_v25 }
 0x2fb   : > { %v2674_v49 = vadd.f32 %v3670_v62, %v3540_v30  ;;  %v2716_v20 = vadd.f32 %v5481_v33, %v2693_v13  ;;  %v830_v62 = vadd.f32 %v5544_v9, %v5914_v61 }
 0x2fc   : > { %v3542_v3 = vpop.f32.mrf.mxu1 }
 0x2fd   : > { %v2694_v11 = vadd.f32 %v2674_v49, %v5469_v23  ;;  %v3543_v58 = vadd.f32 %v3542_v3, %v3541_v38  ;;  %v2732_v2 = vmax.f32 %v2716_v20, 0.0  ;;  %v5539_v23 = vld [vmem:[%s5683_s9] ss:$0 sm:$0xff]  ;;  %v5921_v3 = vld [vmem:[#allocation37_spill] sm:$0xff] }
 0x2ff   : > { %v2677_v48 = vadd.f32 %v3671_v22, %v3543_v58  ;;  %v2741_v10 = vpack.c.bf16 %v2732_v2, %v2731_v36  ;;  %v2717_v16 = vadd.f32 %v5481_v33, %v2694_v11  ;;  %v836_v22 = vadd.f32 %v5544_v9, %v5917_v39  ;;  %v5922_v2 = vld [vmem:[#allocation32_spill] sm:$0xff] }
 0x300   : > { %v840_v11 = vadd.f32 %v5544_v9, %v5921_v3 }
 0x301   : > { %v2695_v56 = vadd.f32 %v2677_v48, %v5475_v29  ;;  %3700 = vmatprep.mubr.bf16.mxu1 %v2741_v10  ;;  %v2733_v41 = vmax.f32 %v2717_v16, 0.0  ;;  %v832_v29 = vadd.f32 %v5544_v9, %v5913_v51  ;;  %v838_v48 = vadd.f32 %v5544_v9, %v5922_v2 }
 0x303   : > { %v2718_v8 = vadd.f32 %v5481_v33, %v2695_v56 }
 0x305   : > { %v2734_v59 = vmax.f32 %v2718_v8, 0.0  ;;  %v5923_v8 = vld [vmem:[#allocation38_spill] sm:$0xff] }
 0x307   : > { %v2742_v5 = vpack.c.bf16 %v2734_v59, %v2733_v41  ;;  %v841_v41 = vadd.f32 %v5544_v9, %v5923_v8 }
 0x309   : > { %3701 = vmatmul.mubr.bf16.vlgmr.msra.gmra.mxu1 %v2742_v5 }
 0x399   : > { %v3690_v52 = vpop.f32.mrf.mxu0 }
 0x39a   : > { %v2857_v33 = vadd.f32 %v3690_v52, %v5539_v23 }
 0x39b   : > { %v2848_v19 = vpop.f32.mrf.mxu0 }
 0x39c   : > { %v2913_v17 = vadd.f32 %v2857_v33, %v832_v29  ;;  %v2849_v63 = vadd.f32 %v5539_v23, %v2848_v19  ;;  %v5924_v29 = vld [vmem:[#allocation33_spill] sm:$0xff] }
 0x39d   : > { %v3691_v31 = vpop.f32.mrf.mxu0  ;;  %v839_v33 = vadd.f32 %v5544_v9, %v5924_v29 }
 0x39e   : > { %v2929_v43 = vmax.f32 %v2913_v17, 0.0  ;;  %v2911_v18 = vadd.f32 %v2849_v63, %v830_v62  ;;  %v2860_v54 = vadd.f32 %v3691_v31, %v5539_v23 }
 0x39f   : > { %v2851_v40 = vpop.f32.mrf.mxu0 }
 0x3a0   : > { %2945 = vst [vmem:[%s5558_s1 + $0x10] sm:$0xff] %v2929_v43  ;;  %v2927_v60 = vmax.f32 %v2911_v18, 0.0  ;;  %v2914_v28 = vadd.f32 %v2860_v54, %v833_v24  ;;  %v2852_v34 = vadd.f32 %v5539_v23, %v2851_v40  ;;  %v5926_v24 = vld [vmem:[#allocation47_spill] sm:$0xff]  ;;  %v5927_v40 = vld [vmem:[#allocation42_spill] sm:$0xff] }
 0x3a1   : > { %v844_v43 = vadd.f32 %v5544_v9, %v5926_v24  ;;  %v842_v26 = vadd.f32 %v5544_v9, %v5927_v40 }
 0x3a2   : > { %2943 = vst [vmem:[%s5558_s1] sm:$0xff] %v2927_v60  ;;  %v2930_v37 = vmax.f32 %v2914_v28, 0.0  ;;  %v2912_v53 = vadd.f32 %v2852_v34, %v831_v50  ;;  %v5928_v34 = vld [vmem:[#allocation48_spill] sm:$0xff] }
 0x3a4   : > { %2946 = vst [vmem:[%s5558_s1 + $0x18] sm:$0xff] %v2930_v37  ;;  %v2928_v32 = vmax.f32 %v2912_v53, 0.0  ;;  %v845_v37 = vadd.f32 %v5544_v9, %v5928_v34 }
 0x3a6   : > { %2944 = vst [vmem:[%s5558_s1 + $0x8] sm:$0xff] %v2928_v32 }
 0x3a9   : > { %v3694_v1 = vpop.f32.mrf.mxu0 }
 0x3aa   : > { %v2873_v6 = vadd.f32 %v3694_v1, %v5539_v23 }
 0x3ab   : > { %v2864_v4 = vpop.f32.mrf.mxu0 }
 0x3ac   : > { %v2917_v12 = vadd.f32 %v2873_v6, %v836_v22  ;;  %v2865_v45 = vadd.f32 %v5539_v23, %v2864_v4  ;;  %v5929_v22 = vld [vmem:[#allocation43_spill] sm:$0xff] }
 0x3ad   : > { %v3695_v55 = vpop.f32.mrf.mxu0  ;;  %v843_v6 = vadd.f32 %v5544_v9, %v5929_v22 }
 0x3ae   : > { %v2933_v21 = vmax.f32 %v2917_v12, 0.0  ;;  %v2915_v57 = vadd.f32 %v2865_v45, %v834_v46  ;;  %v2876_v0 = vadd.f32 %v3695_v55, %v5539_v23 }
 0x3af   : > { %v2867_v44 = vpop.f32.mrf.mxu0 }
 0x3b0   : > { %2949 = vst [vmem:[%s5558_s1 + $0x30] sm:$0xff] %v2933_v21  ;;  %v2931_v15 = vmax.f32 %v2915_v57, 0.0  ;;  %v2918_v13 = vadd.f32 %v2876_v0, %v837_v47  ;;  %v2868_v30 = vadd.f32 %v5539_v23, %v2867_v44 }
 0x3b2   : > { %2947 = vst [vmem:[%s5558_s1 + $0x20] sm:$0xff] %v2931_v15  ;;  %v2934_v35 = vmax.f32 %v2918_v13, 0.0  ;;  %v2916_v38 = vadd.f32 %v2868_v30, %v835_v42 }
 0x3b4   : > { %2950 = vst [vmem:[%s5558_s1 + $0x38] sm:$0xff] %v2934_v35  ;;  %v2932_v49 = vmax.f32 %v2916_v38, 0.0 }
 0x3b6   : > { %2948 = vst [vmem:[%s5558_s1 + $0x28] sm:$0xff] %v2932_v49 }
 0x3b9   : > { %v3698_v20 = vpop.f32.mrf.mxu0 }
 0x3ba   : > { %v2889_v58 = vadd.f32 %v3698_v20, %v5539_v23 }
 0x3bb   : > { %v2880_v36 = vpop.f32.mrf.mxu0 }
 0x3bc   : > { %v2921_v10 = vadd.f32 %v2889_v58, %v840_v11  ;;  %v2881_v16 = vadd.f32 %v5539_v23, %v2880_v36 }
 0x3bd   : > { %v3699_v56 = vpop.f32.mrf.mxu0 }
 0x3be   : > { %v2937_v59 = vmax.f32 %v2921_v10, 0.0  ;;  %v2919_v5 = vadd.f32 %v2881_v16, %v838_v48  ;;  %v2892_v52 = vadd.f32 %v3699_v56, %v5539_v23 }
 0x3bf   : > { %v2883_v51 = vpop.f32.mrf.mxu0 }
 0x3c0   : > { %2953 = vst [vmem:[%s5558_s1 + $0x50] sm:$0xff] %v2937_v59  ;;  %v2935_v19 = vmax.f32 %v2919_v5, 0.0  ;;  %v2922_v61 = vadd.f32 %v2892_v52, %v841_v41  ;;  %v2884_v62 = vadd.f32 %v5539_v23, %v2883_v51 }
 0x3c2   : > { %2951 = vst [vmem:[%s5558_s1 + $0x40] sm:$0xff] %v2935_v19  ;;  %v2938_v17 = vmax.f32 %v2922_v61, 0.0  ;;  %v2920_v63 = vadd.f32 %v2884_v62, %v839_v33 }
 0x3c4   : > { %2954 = vst [vmem:[%s5558_s1 + $0x58] sm:$0xff] %v2938_v17  ;;  %v2936_v31 = vmax.f32 %v2920_v63, 0.0 }
 0x3c6   : > { %2952 = vst [vmem:[%s5558_s1 + $0x48] sm:$0xff] %v2936_v31 }
 0x3c9   : > { %v3702_v14 = vpop.f32.mrf.mxu1 }
 0x3ca   : > { %v2905_v18 = vadd.f32 %v3702_v14, %v5539_v23 }
 0x3cb   : > { %v2896_v54 = vpop.f32.mrf.mxu1 }
 0x3cc   : > { %v2925_v50 = vadd.f32 %v2905_v18, %v844_v43  ;;  %v2897_v60 = vadd.f32 %v5539_v23, %v2896_v54 }
 0x3cd   : > { %v3703_v28 = vpop.f32.mrf.mxu1 }
 0x3ce   : > { %v2941_v53 = vmax.f32 %v2925_v50, 0.0  ;;  %v2923_v32 = vadd.f32 %v2897_v60, %v842_v26  ;;  %v2908_v1 = vadd.f32 %v3703_v28, %v5539_v23 }
 0x3cf   : > { %v2899_v39 = vpop.f32.mrf.mxu1 }
 0x3d0   : > { %2957 = vst [vmem:[%s5558_s1 + $0x70] sm:$0xff] %v2941_v53  ;;  %v2939_v4 = vmax.f32 %v2923_v32, 0.0  ;;  %v2926_v27 = vadd.f32 %v2908_v1, %v845_v37  ;;  %v2900_v46 = vadd.f32 %v5539_v23, %v2899_v39 }
 0x3d2   : > { %2955 = vst [vmem:[%s5558_s1 + $0x60] sm:$0xff] %v2939_v4  ;;  %v2942_v12 = vmax.f32 %v2926_v27, 0.0  ;;  %v2924_v45 = vadd.f32 %v2900_v46, %v843_v6 }
 0x3d4   : > { %2958 = vst [vmem:[%s5558_s1 + $0x78] sm:$0xff] %v2942_v12  ;;  %v2940_v9 = vmax.f32 %v2924_v45, 0.0 }
 0x3d6   : > { %2956 = vst [vmem:[%s5558_s1 + $0x68] sm:$0xff] %v2940_v9 }
 0x3d7   : > { %4145 = shalt.err (!%p4142_p0)
}
 0x3d8   : > { %s4146_s4 = scalar_lea.hbm %s5617_s29, 2048  ;;  %s4150_s3 = scalar_lea.hbm %s5930_s23, 8192 }
 0x3d9   : > { %p4147_p2 = scmp.ne.s32.totalorder %s5617_s29, %s4146_s4  ;;  %p4151_p11 = scmp.lt.s32.totalorder %s5617_s29, %s5930_s23 }
 0x3da   : > { %p4152_p6 = scmp.lt.s32.totalorder %s4150_s3, %s4146_s4 }
 0x3db   : > { %p4148_p4 = pnand %p4147_p2, %p4452_p8 }
 0x3dc   : > { %p4153_p1 = por %p4152_p6, %p4151_p11 }
 0x3dd   : > { %p4149_p10 = pneg %p4148_p4 }
 0x3df   : > { %p4154_p3 = pnand %p4153_p1, %p4149_p10 }
 0x3e1   : > { %4157 = shalt.err (!%p4154_p3)
}
 0x3e2   : > { %s4254_s26 = smov 128   ;;  %s4255_s16 = smov 8  }
 0x3e3   : > { %3746 = dma.vmem_to_hbm [thread:$0]  (%p4452_p8), %s5619_s5, 2048, %s5617_s29, %s2960_s10, %s4254_s26, %s4254_s26, %s4255_s16  }
 0x3e4 PF: > { %p3783_p7 = scmp.ge.s32.totalorder %s4240_s20, 2  ;;  %s2990_s6 = sand.u32 1, %s4212_s13  }
 0x3e5   : > { %s2991_s22 = scalar_lea.sflag [#allocation4], %s2990_s6 }
 0x3e6   : > { %p3769_p13 = pnand %p3783_p7, %p4458_p9 }
 0x3e8   : > { %p3770_p12 = pneg %p3769_p13 }
 0x3ea   : > { %4207 = dma.done.wait (%p3770_p12), %s2991_s22, 2048  }
 0x3eb   : > { %4209 = vsyncadd (%p3770_p12), %s2991_s22, 4294965248  ;;  %s29_s20 = sadd.s32 1, %s4240_s20   ;;  %s5931_s17 = sld [smem:[#allocation20_spill]] }
 0x3ec   : > { %p26_p5 = scmp.ge.s32.totalorder %s29_s20, 6   ;;  %s5932_s11 = sld [smem:[#allocation21_spill]] }
 0x3ed   : > { %s5933_s19 = sld [smem:[#allocation22_spill]]  ;;  %s5934_s13 = smov %s4216_s14 }
 0x3ee   : > { %s5935_s14 = smov %s4220_s15  ;;  %s5936_s15 = smov %s4468_s30 }
 0x3ef   : > { %s5937_s16 = smov %s4232_s18  ;;  %28 = sbr.rel (!%p26_p5) target bundleno = 18 (0x12), region = 125 }
 0x3f2   : > { %s5938_s18 = smov %s5932_s11 }
 0x3f4   :  { %2996 = vsyncpa [#allocation3], 1 }
 0x3f5   :  { %2998 = vsyncpa [#allocation3 + $0x1], 1 }
 0x3f6   :  { %2999 = vsyncpa [#allocation6], 1 }
 0x3f7   :  { %3000 = vsyncpa [#allocation9], 1 }
 0x3f8   :  { %3001 = vsyncpa [#allocation12], 1 }
 0x3f9   :  { %3002 = vsyncpa [#allocation4], 1 }
 0x3fa   :  { %3004 = vsyncpa [#allocation4 + $0x1], 1 }

</bundles_post_ra>
